<compile_context>
chip_gen: v7x
topology: tpu7x:2x2x1
jax: 0.10.0
libtpu: 0.0.40
codegen_flags: <defaults>
</compile_context>

<pallas_src>
import functools
import math

import jax
import jax.numpy as jnp
import numpy as np
from jax.experimental import pallas as pl
from jax.experimental.pallas import tpu as pltpu


def _choose_tile_rows(batch, num_fields, target_lookups=64):
    """Rows of x per grid step, chosen so tile_lookups = rows*num_fields is a
    multiple of 8 (f32 sublane tiling) and roughly `target_lookups` big."""
    base = 8 // math.gcd(8, num_fields)            # smallest rows s.t. rows*F % 8 == 0
    rows = base * max(1, target_lookups // (base * num_fields))
    cap = base * (-(-batch // base))               # no more rows than (padded) batch
    return max(base, min(rows, cap))


def _make_gather_kernel(tile_lookups, num_fields):
    def kernel(xflat_ref, off_ref, table_ref, out_ref, buf_ref, sem_ref):
        i = pl.program_id(0)
        base = i * tile_lookups
        copies = []
        for j in range(tile_lookups):              # static unroll: tile_lookups DMAs
            # offset add done with scalars in SMEM; j % num_fields is a Python const.
            row = xflat_ref[base + j] + off_ref[j % num_fields]
            cp = pltpu.make_async_copy(
                table_ref.at[pl.ds(row, 1)],       # (1, embed_dim) row in HBM
                buf_ref.at[pl.ds(j, 1)],           # (1, embed_dim) slot in VMEM scratch
                sem_ref.at[j])
            cp.start()
            copies.append(cp)
        for cp in copies:
            cp.wait()
        out_ref[...] = buf_ref[...]
    return kernel


@jax.jit
def features_embedding_forward(x, table, offsets):
    """x: [batch, num_fields] int32, table: [sum(field_dims), embed_dim],
    offsets: [num_fields] int32. Returns [batch, num_fields, embed_dim]."""
    batch, num_fields = x.shape
    _, embed_dim = table.shape

    tile_rows = _choose_tile_rows(batch, num_fields)
    padded_batch = -(-batch // tile_rows) * tile_rows
    tile_lookups = tile_rows * num_fields
    num_tiles = padded_batch // tile_rows
    total_lookups = padded_batch * num_fields

    # Pad batch to a whole number of tiles (pad index 0 -> valid row; discarded later).
    x_pad = jnp.pad(x.astype(jnp.int32), ((0, padded_batch - batch), (0, 0)))
    xflat = x_pad.reshape(-1)

    itemsize = jnp.dtype(table.dtype).itemsize
    cost = pl.CostEstimate(
        flops=0,
        transcendentals=0,
        bytes_accessed=2 * total_lookups * embed_dim * itemsize + total_lookups * 4)

    kernel = _make_gather_kernel(tile_lookups, num_fields)

    out_flat = pl.pallas_call(
        kernel,
        out_shape=jax.ShapeDtypeStruct((total_lookups, embed_dim), table.dtype),
        grid_spec=pltpu.PrefetchScalarGridSpec(
            num_scalar_prefetch=2,                         # xflat, offsets -> SMEM
            grid=(num_tiles,),
            in_specs=[pl.BlockSpec(memory_space=pl.ANY)],  # table stays in HBM
            out_specs=pl.BlockSpec((tile_lookups, embed_dim),
                                   lambda i, xflat, off: (i, 0)),
            scratch_shapes=[
                pltpu.VMEM((tile_lookups, embed_dim), table.dtype),
                pltpu.SemaphoreType.DMA((tile_lookups,)),
            ]),
        compiler_params=pltpu.CompilerParams(dimension_semantics=("parallel",)),
        cost_estimate=cost,
    )(xflat, offsets.astype(jnp.int32), table)

    out = out_flat.reshape(padded_batch, num_fields, embed_dim)
    return out[:batch]


def init_params(key, field_dims, embed_dim, dtype=jnp.float32):
    """Same shapes/init style as the PyTorch module (xavier_uniform table)."""
    n_rows = int(np.sum(field_dims))
    bound = math.sqrt(6.0 / (n_rows + embed_dim))
    table = jax.random.uniform(key, (n_rows, embed_dim), dtype, -bound, bound)
    offsets = jnp.asarray(np.concatenate(([0], np.cumsum(field_dims)[:-1])),
                          dtype=jnp.int32)
    return table, offsets


def _reference_forward(x, table, offsets):
    idx = x + offsets[None, :]
    return jnp.take(table, idx, axis=0)


if __name__ == "__main__":
    key = jax.random.PRNGKey(0)
    field_dims = np.array([10, 20, 30, 40], dtype=np.int32)
    embed_dim = 16
    batch = 8

    k_tab, k_x = jax.random.split(key)
    table, offsets = init_params(k_tab, field_dims, embed_dim)

    # One categorical index per field, each within its field's cardinality.
    cols = []
    for f in range(len(field_dims)):
        kf = jax.random.fold_in(k_x, f)
        cols.append(jax.random.randint(kf, (batch,), 0, int(field_dims[f])))
    x = jnp.stack(cols, axis=1).astype(jnp.int32)

    out = features_embedding_forward(x, table, offsets)
    out = jax.block_until_ready(out)

    ref = _reference_forward(x, table, offsets)
    assert out.shape == (batch, len(field_dims), embed_dim), out.shape
    assert jnp.array_equal(out, ref), "mismatch vs reference"

    print("KERNEL_OK")
</pallas_src>

<mosaic_0001>
module attributes {stable_mosaic.version = 11 : i64} {
  func.func @kernel(%arg0: i32, %arg1: memref<32xi32, #tpu.memory_space<smem>>, %arg2: memref<4xi32, #tpu.memory_space<smem>>, %arg3: memref<100x16xf32, #tpu.memory_space<any>>, %arg4: memref<32x16xf32, #tpu.memory_space<vmem>>, %arg5: memref<32x16xf32, #tpu.memory_space<vmem>>, %arg6: memref<32x!tpu.dma_semaphore, #tpu.memory_space<semaphore_mem>>) attributes {dimension_semantics = [#tpu.dimension_semantics<parallel>], iteration_bounds = array<i64: 1>, scalar_prefetch = 2 : i64, scratch_operands = 2 : i64, tpu.core_type = #tpu.core_type<tc>, window_params = [{}, {transform_indices = @transform_1, window_bounds = array<i64: 32, 16>}]} {
    %c32_i32 = arith.constant 32 : i32
    %0 = arith.muli %arg0, %c32_i32 : i32
    %c0_i32 = arith.constant 0 : i32
    %1 = arith.addi %0, %c0_i32 : i32
    %2 = arith.index_cast %1 : i32 to index
    %3 = memref.load %arg1[%2] : memref<32xi32, #tpu.memory_space<smem>>
    %c0 = arith.constant 0 : index
    %4 = memref.load %arg2[%c0] : memref<4xi32, #tpu.memory_space<smem>>
    %5 = arith.addi %3, %4 : i32
    %c0_i32_0 = arith.constant 0 : i32
    %c0_i32_1 = arith.constant 0 : i32
    %6 = tpu.memref_slice %arg3[%5, %c0_i32_1] : memref<100x16xf32, #tpu.memory_space<any>> -> memref<1x16xf32, #tpu.memory_space<any>>
    %c0_i32_2 = arith.constant 0 : i32
    %c0_i32_3 = arith.constant 0 : i32
    %7 = tpu.memref_slice %arg5[%c0_i32_2, %c0_i32_3] : memref<32x16xf32, #tpu.memory_space<vmem>> -> memref<1x16xf32, #tpu.memory_space<vmem>>
    %8 = tpu.memref_slice %arg6[%c0_i32_0] : memref<32x!tpu.dma_semaphore, #tpu.memory_space<semaphore_mem>> -> memref<1x!tpu.dma_semaphore, #tpu.memory_space<semaphore_mem>>
    %9 = tpu.memref_squeeze %8 : memref<1x!tpu.dma_semaphore, #tpu.memory_space<semaphore_mem>> -> memref<!tpu.dma_semaphore, #tpu.memory_space<semaphore_mem>>
    tpu.enqueue_dma source(%6 : memref<1x16xf32, #tpu.memory_space<any>>) target(%7 : memref<1x16xf32, #tpu.memory_space<vmem>>) target_semaphore(%9 : memref<!tpu.dma_semaphore, #tpu.memory_space<semaphore_mem>>)
    %c1_i32 = arith.constant 1 : i32
    %10 = arith.addi %0, %c1_i32 : i32
    %11 = arith.index_cast %10 : i32 to index
    %12 = memref.load %arg1[%11] : memref<32xi32, #tpu.memory_space<smem>>
    %c1 = arith.constant 1 : index
    %13 = memref.load %arg2[%c1] : memref<4xi32, #tpu.memory_space<smem>>
    %14 = arith.addi %12, %13 : i32
    %c1_i32_4 = arith.constant 1 : i32
    %c0_i32_5 = arith.constant 0 : i32
    %15 = tpu.memref_slice %arg3[%14, %c0_i32_5] : memref<100x16xf32, #tpu.memory_space<any>> -> memref<1x16xf32, #tpu.memory_space<any>>
    %c1_i32_6 = arith.constant 1 : i32
    %c0_i32_7 = arith.constant 0 : i32
    %16 = tpu.memref_slice %arg5[%c1_i32_6, %c0_i32_7] : memref<32x16xf32, #tpu.memory_space<vmem>> -> memref<1x16xf32, #tpu.memory_space<vmem>>
    %17 = tpu.memref_slice %arg6[%c1_i32_4] : memref<32x!tpu.dma_semaphore, #tpu.memory_space<semaphore_mem>> -> memref<1x!tpu.dma_semaphore, #tpu.memory_space<semaphore_mem>>
    %18 = tpu.memref_squeeze %17 : memref<1x!tpu.dma_semaphore, #tpu.memory_space<semaphore_mem>> -> memref<!tpu.dma_semaphore, #tpu.memory_space<semaphore_mem>>
    tpu.enqueue_dma source(%15 : memref<1x16xf32, #tpu.memory_space<any>>) target(%16 : memref<1x16xf32, #tpu.memory_space<vmem>>) target_semaphore(%18 : memref<!tpu.dma_semaphore, #tpu.memory_space<semaphore_mem>>)
    %c2_i32 = arith.constant 2 : i32
    %19 = arith.addi %0, %c2_i32 : i32
    %20 = arith.index_cast %19 : i32 to index
    %21 = memref.load %arg1[%20] : memref<32xi32, #tpu.memory_space<smem>>
    %c2 = arith.constant 2 : index
    %22 = memref.load %arg2[%c2] : memref<4xi32, #tpu.memory_space<smem>>
    %23 = arith.addi %21, %22 : i32
    %c2_i32_8 = arith.constant 2 : i32
    %c0_i32_9 = arith.constant 0 : i32
    %24 = tpu.memref_slice %arg3[%23, %c0_i32_9] : memref<100x16xf32, #tpu.memory_space<any>> -> memref<1x16xf32, #tpu.memory_space<any>>
    %c2_i32_10 = arith.constant 2 : i32
    %c0_i32_11 = arith.constant 0 : i32
    %25 = tpu.memref_slice %arg5[%c2_i32_10, %c0_i32_11] : memref<32x16xf32, #tpu.memory_space<vmem>> -> memref<1x16xf32, #tpu.memory_space<vmem>>
    %26 = tpu.memref_slice %arg6[%c2_i32_8] : memref<32x!tpu.dma_semaphore, #tpu.memory_space<semaphore_mem>> -> memref<1x!tpu.dma_semaphore, #tpu.memory_space<semaphore_mem>>
    %27 = tpu.memref_squeeze %26 : memref<1x!tpu.dma_semaphore, #tpu.memory_space<semaphore_mem>> -> memref<!tpu.dma_semaphore, #tpu.memory_space<semaphore_mem>>
    tpu.enqueue_dma source(%24 : memref<1x16xf32, #tpu.memory_space<any>>) target(%25 : memref<1x16xf32, #tpu.memory_space<vmem>>) target_semaphore(%27 : memref<!tpu.dma_semaphore, #tpu.memory_space<semaphore_mem>>)
    %c3_i32 = arith.constant 3 : i32
    %28 = arith.addi %0, %c3_i32 : i32
    %29 = arith.index_cast %28 : i32 to index
    %30 = memref.load %arg1[%29] : memref<32xi32, #tpu.memory_space<smem>>
    %c3 = arith.constant 3 : index
    %31 = memref.load %arg2[%c3] : memref<4xi32, #tpu.memory_space<smem>>
    %32 = arith.addi %30, %31 : i32
    %c3_i32_12 = arith.constant 3 : i32
    %c0_i32_13 = arith.constant 0 : i32
    %33 = tpu.memref_slice %arg3[%32, %c0_i32_13] : memref<100x16xf32, #tpu.memory_space<any>> -> memref<1x16xf32, #tpu.memory_space<any>>
    %c3_i32_14 = arith.constant 3 : i32
    %c0_i32_15 = arith.constant 0 : i32
    %34 = tpu.memref_slice %arg5[%c3_i32_14, %c0_i32_15] : memref<32x16xf32, #tpu.memory_space<vmem>> -> memref<1x16xf32, #tpu.memory_space<vmem>>
    %35 = tpu.memref_slice %arg6[%c3_i32_12] : memref<32x!tpu.dma_semaphore, #tpu.memory_space<semaphore_mem>> -> memref<1x!tpu.dma_semaphore, #tpu.memory_space<semaphore_mem>>
    %36 = tpu.memref_squeeze %35 : memref<1x!tpu.dma_semaphore, #tpu.memory_space<semaphore_mem>> -> memref<!tpu.dma_semaphore, #tpu.memory_space<semaphore_mem>>
    tpu.enqueue_dma source(%33 : memref<1x16xf32, #tpu.memory_space<any>>) target(%34 : memref<1x16xf32, #tpu.memory_space<vmem>>) target_semaphore(%36 : memref<!tpu.dma_semaphore, #tpu.memory_space<semaphore_mem>>)
    %c4_i32 = arith.constant 4 : i32
    %37 = arith.addi %0, %c4_i32 : i32
    %38 = arith.index_cast %37 : i32 to index
    %39 = memref.load %arg1[%38] : memref<32xi32, #tpu.memory_space<smem>>
    %c0_16 = arith.constant 0 : index
    %40 = memref.load %arg2[%c0_16] : memref<4xi32, #tpu.memory_space<smem>>
    %41 = arith.addi %39, %40 : i32
    %c4_i32_17 = arith.constant 4 : i32
    %c0_i32_18 = arith.constant 0 : i32
    %42 = tpu.memref_slice %arg3[%41, %c0_i32_18] : memref<100x16xf32, #tpu.memory_space<any>> -> memref<1x16xf32, #tpu.memory_space<any>>
    %c4_i32_19 = arith.constant 4 : i32
    %c0_i32_20 = arith.constant 0 : i32
    %43 = tpu.memref_slice %arg5[%c4_i32_19, %c0_i32_20] : memref<32x16xf32, #tpu.memory_space<vmem>> -> memref<1x16xf32, #tpu.memory_space<vmem>>
    %44 = tpu.memref_slice %arg6[%c4_i32_17] : memref<32x!tpu.dma_semaphore, #tpu.memory_space<semaphore_mem>> -> memref<1x!tpu.dma_semaphore, #tpu.memory_space<semaphore_mem>>
    %45 = tpu.memref_squeeze %44 : memref<1x!tpu.dma_semaphore, #tpu.memory_space<semaphore_mem>> -> memref<!tpu.dma_semaphore, #tpu.memory_space<semaphore_mem>>
    tpu.enqueue_dma source(%42 : memref<1x16xf32, #tpu.memory_space<any>>) target(%43 : memref<1x16xf32, #tpu.memory_space<vmem>>) target_semaphore(%45 : memref<!tpu.dma_semaphore, #tpu.memory_space<semaphore_mem>>)
    %c5_i32 = arith.constant 5 : i32
    %46 = arith.addi %0, %c5_i32 : i32
    %47 = arith.index_cast %46 : i32 to index
    %48 = memref.load %arg1[%47] : memref<32xi32, #tpu.memory_space<smem>>
    %c1_21 = arith.constant 1 : index
    %49 = memref.load %arg2[%c1_21] : memref<4xi32, #tpu.memory_space<smem>>
    %50 = arith.addi %48, %49 : i32
    %c5_i32_22 = arith.constant 5 : i32
    %c0_i32_23 = arith.constant 0 : i32
    %51 = tpu.memref_slice %arg3[%50, %c0_i32_23] : memref<100x16xf32, #tpu.memory_space<any>> -> memref<1x16xf32, #tpu.memory_space<any>>
    %c5_i32_24 = arith.constant 5 : i32
    %c0_i32_25 = arith.constant 0 : i32
    %52 = tpu.memref_slice %arg5[%c5_i32_24, %c0_i32_25] : memref<32x16xf32, #tpu.memory_space<vmem>> -> memref<1x16xf32, #tpu.memory_space<vmem>>
    %53 = tpu.memref_slice %arg6[%c5_i32_22] : memref<32x!tpu.dma_semaphore, #tpu.memory_space<semaphore_mem>> -> memref<1x!tpu.dma_semaphore, #tpu.memory_space<semaphore_mem>>
    %54 = tpu.memref_squeeze %53 : memref<1x!tpu.dma_semaphore, #tpu.memory_space<semaphore_mem>> -> memref<!tpu.dma_semaphore, #tpu.memory_space<semaphore_mem>>
    tpu.enqueue_dma source(%51 : memref<1x16xf32, #tpu.memory_space<any>>) target(%52 : memref<1x16xf32, #tpu.memory_space<vmem>>) target_semaphore(%54 : memref<!tpu.dma_semaphore, #tpu.memory_space<semaphore_mem>>)
    %c6_i32 = arith.constant 6 : i32
    %55 = arith.addi %0, %c6_i32 : i32
    %56 = arith.index_cast %55 : i32 to index
    %57 = memref.load %arg1[%56] : memref<32xi32, #tpu.memory_space<smem>>
    %c2_26 = arith.constant 2 : index
    %58 = memref.load %arg2[%c2_26] : memref<4xi32, #tpu.memory_space<smem>>
    %59 = arith.addi %57, %58 : i32
    %c6_i32_27 = arith.constant 6 : i32
    %c0_i32_28 = arith.constant 0 : i32
    %60 = tpu.memref_slice %arg3[%59, %c0_i32_28] : memref<100x16xf32, #tpu.memory_space<any>> -> memref<1x16xf32, #tpu.memory_space<any>>
    %c6_i32_29 = arith.constant 6 : i32
    %c0_i32_30 = arith.constant 0 : i32
    %61 = tpu.memref_slice %arg5[%c6_i32_29, %c0_i32_30] : memref<32x16xf32, #tpu.memory_space<vmem>> -> memref<1x16xf32, #tpu.memory_space<vmem>>
    %62 = tpu.memref_slice %arg6[%c6_i32_27] : memref<32x!tpu.dma_semaphore, #tpu.memory_space<semaphore_mem>> -> memref<1x!tpu.dma_semaphore, #tpu.memory_space<semaphore_mem>>
    %63 = tpu.memref_squeeze %62 : memref<1x!tpu.dma_semaphore, #tpu.memory_space<semaphore_mem>> -> memref<!tpu.dma_semaphore, #tpu.memory_space<semaphore_mem>>
    tpu.enqueue_dma source(%60 : memref<1x16xf32, #tpu.memory_space<any>>) target(%61 : memref<1x16xf32, #tpu.memory_space<vmem>>) target_semaphore(%63 : memref<!tpu.dma_semaphore, #tpu.memory_space<semaphore_mem>>)
    %c7_i32 = arith.constant 7 : i32
    %64 = arith.addi %0, %c7_i32 : i32
    %65 = arith.index_cast %64 : i32 to index
    %66 = memref.load %arg1[%65] : memref<32xi32, #tpu.memory_space<smem>>
    %c3_31 = arith.constant 3 : index
    %67 = memref.load %arg2[%c3_31] : memref<4xi32, #tpu.memory_space<smem>>
    %68 = arith.addi %66, %67 : i32
    %c7_i32_32 = arith.constant 7 : i32
    %c0_i32_33 = arith.constant 0 : i32
    %69 = tpu.memref_slice %arg3[%68, %c0_i32_33] : memref<100x16xf32, #tpu.memory_space<any>> -> memref<1x16xf32, #tpu.memory_space<any>>
    %c7_i32_34 = arith.constant 7 : i32
    %c0_i32_35 = arith.constant 0 : i32
    %70 = tpu.memref_slice %arg5[%c7_i32_34, %c0_i32_35] : memref<32x16xf32, #tpu.memory_space<vmem>> -> memref<1x16xf32, #tpu.memory_space<vmem>>
    %71 = tpu.memref_slice %arg6[%c7_i32_32] : memref<32x!tpu.dma_semaphore, #tpu.memory_space<semaphore_mem>> -> memref<1x!tpu.dma_semaphore, #tpu.memory_space<semaphore_mem>>
    %72 = tpu.memref_squeeze %71 : memref<1x!tpu.dma_semaphore, #tpu.memory_space<semaphore_mem>> -> memref<!tpu.dma_semaphore, #tpu.memory_space<semaphore_mem>>
    tpu.enqueue_dma source(%69 : memref<1x16xf32, #tpu.memory_space<any>>) target(%70 : memref<1x16xf32, #tpu.memory_space<vmem>>) target_semaphore(%72 : memref<!tpu.dma_semaphore, #tpu.memory_space<semaphore_mem>>)
    %c8_i32 = arith.constant 8 : i32
    %73 = arith.addi %0, %c8_i32 : i32
    %74 = arith.index_cast %73 : i32 to index
    %75 = memref.load %arg1[%74] : memref<32xi32, #tpu.memory_space<smem>>
    %c0_36 = arith.constant 0 : index
    %76 = memref.load %arg2[%c0_36] : memref<4xi32, #tpu.memory_space<smem>>
    %77 = arith.addi %75, %76 : i32
    %c8_i32_37 = arith.constant 8 : i32
    %c0_i32_38 = arith.constant 0 : i32
    %78 = tpu.memref_slice %arg3[%77, %c0_i32_38] : memref<100x16xf32, #tpu.memory_space<any>> -> memref<1x16xf32, #tpu.memory_space<any>>
    %c8_i32_39 = arith.constant 8 : i32
    %c0_i32_40 = arith.constant 0 : i32
    %79 = tpu.memref_slice %arg5[%c8_i32_39, %c0_i32_40] : memref<32x16xf32, #tpu.memory_space<vmem>> -> memref<1x16xf32, #tpu.memory_space<vmem>>
    %80 = tpu.memref_slice %arg6[%c8_i32_37] : memref<32x!tpu.dma_semaphore, #tpu.memory_space<semaphore_mem>> -> memref<1x!tpu.dma_semaphore, #tpu.memory_space<semaphore_mem>>
    %81 = tpu.memref_squeeze %80 : memref<1x!tpu.dma_semaphore, #tpu.memory_space<semaphore_mem>> -> memref<!tpu.dma_semaphore, #tpu.memory_space<semaphore_mem>>
    tpu.enqueue_dma source(%78 : memref<1x16xf32, #tpu.memory_space<any>>) target(%79 : memref<1x16xf32, #tpu.memory_space<vmem>>) target_semaphore(%81 : memref<!tpu.dma_semaphore, #tpu.memory_space<semaphore_mem>>)
    %c9_i32 = arith.constant 9 : i32
    %82 = arith.addi %0, %c9_i32 : i32
    %83 = arith.index_cast %82 : i32 to index
    %84 = memref.load %arg1[%83] : memref<32xi32, #tpu.memory_space<smem>>
    %c1_41 = arith.constant 1 : index
    %85 = memref.load %arg2[%c1_41] : memref<4xi32, #tpu.memory_space<smem>>
    %86 = arith.addi %84, %85 : i32
    %c9_i32_42 = arith.constant 9 : i32
    %c0_i32_43 = arith.constant 0 : i32
    %87 = tpu.memref_slice %arg3[%86, %c0_i32_43] : memref<100x16xf32, #tpu.memory_space<any>> -> memref<1x16xf32, #tpu.memory_space<any>>
    %c9_i32_44 = arith.constant 9 : i32
    %c0_i32_45 = arith.constant 0 : i32
    %88 = tpu.memref_slice %arg5[%c9_i32_44, %c0_i32_45] : memref<32x16xf32, #tpu.memory_space<vmem>> -> memref<1x16xf32, #tpu.memory_space<vmem>>
    %89 = tpu.memref_slice %arg6[%c9_i32_42] : memref<32x!tpu.dma_semaphore, #tpu.memory_space<semaphore_mem>> -> memref<1x!tpu.dma_semaphore, #tpu.memory_space<semaphore_mem>>
    %90 = tpu.memref_squeeze %89 : memref<1x!tpu.dma_semaphore, #tpu.memory_space<semaphore_mem>> -> memref<!tpu.dma_semaphore, #tpu.memory_space<semaphore_mem>>
    tpu.enqueue_dma source(%87 : memref<1x16xf32, #tpu.memory_space<any>>) target(%88 : memref<1x16xf32, #tpu.memory_space<vmem>>) target_semaphore(%90 : memref<!tpu.dma_semaphore, #tpu.memory_space<semaphore_mem>>)
    %c10_i32 = arith.constant 10 : i32
    %91 = arith.addi %0, %c10_i32 : i32
    %92 = arith.index_cast %91 : i32 to index
    %93 = memref.load %arg1[%92] : memref<32xi32, #tpu.memory_space<smem>>
    %c2_46 = arith.constant 2 : index
    %94 = memref.load %arg2[%c2_46] : memref<4xi32, #tpu.memory_space<smem>>
    %95 = arith.addi %93, %94 : i32
    %c10_i32_47 = arith.constant 10 : i32
    %c0_i32_48 = arith.constant 0 : i32
    %96 = tpu.memref_slice %arg3[%95, %c0_i32_48] : memref<100x16xf32, #tpu.memory_space<any>> -> memref<1x16xf32, #tpu.memory_space<any>>
    %c10_i32_49 = arith.constant 10 : i32
    %c0_i32_50 = arith.constant 0 : i32
    %97 = tpu.memref_slice %arg5[%c10_i32_49, %c0_i32_50] : memref<32x16xf32, #tpu.memory_space<vmem>> -> memref<1x16xf32, #tpu.memory_space<vmem>>
    %98 = tpu.memref_slice %arg6[%c10_i32_47] : memref<32x!tpu.dma_semaphore, #tpu.memory_space<semaphore_mem>> -> memref<1x!tpu.dma_semaphore, #tpu.memory_space<semaphore_mem>>
    %99 = tpu.memref_squeeze %98 : memref<1x!tpu.dma_semaphore, #tpu.memory_space<semaphore_mem>> -> memref<!tpu.dma_semaphore, #tpu.memory_space<semaphore_mem>>
    tpu.enqueue_dma source(%96 : memref<1x16xf32, #tpu.memory_space<any>>) target(%97 : memref<1x16xf32, #tpu.memory_space<vmem>>) target_semaphore(%99 : memref<!tpu.dma_semaphore, #tpu.memory_space<semaphore_mem>>)
    %c11_i32 = arith.constant 11 : i32
    %100 = arith.addi %0, %c11_i32 : i32
    %101 = arith.index_cast %100 : i32 to index
    %102 = memref.load %arg1[%101] : memref<32xi32, #tpu.memory_space<smem>>
    %c3_51 = arith.constant 3 : index
    %103 = memref.load %arg2[%c3_51] : memref<4xi32, #tpu.memory_space<smem>>
    %104 = arith.addi %102, %103 : i32
    %c11_i32_52 = arith.constant 11 : i32
    %c0_i32_53 = arith.constant 0 : i32
    %105 = tpu.memref_slice %arg3[%104, %c0_i32_53] : memref<100x16xf32, #tpu.memory_space<any>> -> memref<1x16xf32, #tpu.memory_space<any>>
    %c11_i32_54 = arith.constant 11 : i32
    %c0_i32_55 = arith.constant 0 : i32
    %106 = tpu.memref_slice %arg5[%c11_i32_54, %c0_i32_55] : memref<32x16xf32, #tpu.memory_space<vmem>> -> memref<1x16xf32, #tpu.memory_space<vmem>>
    %107 = tpu.memref_slice %arg6[%c11_i32_52] : memref<32x!tpu.dma_semaphore, #tpu.memory_space<semaphore_mem>> -> memref<1x!tpu.dma_semaphore, #tpu.memory_space<semaphore_mem>>
    %108 = tpu.memref_squeeze %107 : memref<1x!tpu.dma_semaphore, #tpu.memory_space<semaphore_mem>> -> memref<!tpu.dma_semaphore, #tpu.memory_space<semaphore_mem>>
    tpu.enqueue_dma source(%105 : memref<1x16xf32, #tpu.memory_space<any>>) target(%106 : memref<1x16xf32, #tpu.memory_space<vmem>>) target_semaphore(%108 : memref<!tpu.dma_semaphore, #tpu.memory_space<semaphore_mem>>)
    %c12_i32 = arith.constant 12 : i32
    %109 = arith.addi %0, %c12_i32 : i32
    %110 = arith.index_cast %109 : i32 to index
    %111 = memref.load %arg1[%110] : memref<32xi32, #tpu.memory_space<smem>>
    %c0_56 = arith.constant 0 : index
    %112 = memref.load %arg2[%c0_56] : memref<4xi32, #tpu.memory_space<smem>>
    %113 = arith.addi %111, %112 : i32
    %c12_i32_57 = arith.constant 12 : i32
    %c0_i32_58 = arith.constant 0 : i32
    %114 = tpu.memref_slice %arg3[%113, %c0_i32_58] : memref<100x16xf32, #tpu.memory_space<any>> -> memref<1x16xf32, #tpu.memory_space<any>>
    %c12_i32_59 = arith.constant 12 : i32
    %c0_i32_60 = arith.constant 0 : i32
    %115 = tpu.memref_slice %arg5[%c12_i32_59, %c0_i32_60] : memref<32x16xf32, #tpu.memory_space<vmem>> -> memref<1x16xf32, #tpu.memory_space<vmem>>
    %116 = tpu.memref_slice %arg6[%c12_i32_57] : memref<32x!tpu.dma_semaphore, #tpu.memory_space<semaphore_mem>> -> memref<1x!tpu.dma_semaphore, #tpu.memory_space<semaphore_mem>>
    %117 = tpu.memref_squeeze %116 : memref<1x!tpu.dma_semaphore, #tpu.memory_space<semaphore_mem>> -> memref<!tpu.dma_semaphore, #tpu.memory_space<semaphore_mem>>
    tpu.enqueue_dma source(%114 : memref<1x16xf32, #tpu.memory_space<any>>) target(%115 : memref<1x16xf32, #tpu.memory_space<vmem>>) target_semaphore(%117 : memref<!tpu.dma_semaphore, #tpu.memory_space<semaphore_mem>>)
    %c13_i32 = arith.constant 13 : i32
    %118 = arith.addi %0, %c13_i32 : i32
    %119 = arith.index_cast %118 : i32 to index
    %120 = memref.load %arg1[%119] : memref<32xi32, #tpu.memory_space<smem>>
    %c1_61 = arith.constant 1 : index
    %121 = memref.load %arg2[%c1_61] : memref<4xi32, #tpu.memory_space<smem>>
    %122 = arith.addi %120, %121 : i32
    %c13_i32_62 = arith.constant 13 : i32
    %c0_i32_63 = arith.constant 0 : i32
    %123 = tpu.memref_slice %arg3[%122, %c0_i32_63] : memref<100x16xf32, #tpu.memory_space<any>> -> memref<1x16xf32, #tpu.memory_space<any>>
    %c13_i32_64 = arith.constant 13 : i32
    %c0_i32_65 = arith.constant 0 : i32
    %124 = tpu.memref_slice %arg5[%c13_i32_64, %c0_i32_65] : memref<32x16xf32, #tpu.memory_space<vmem>> -> memref<1x16xf32, #tpu.memory_space<vmem>>
    %125 = tpu.memref_slice %arg6[%c13_i32_62] : memref<32x!tpu.dma_semaphore, #tpu.memory_space<semaphore_mem>> -> memref<1x!tpu.dma_semaphore, #tpu.memory_space<semaphore_mem>>
    %126 = tpu.memref_squeeze %125 : memref<1x!tpu.dma_semaphore, #tpu.memory_space<semaphore_mem>> -> memref<!tpu.dma_semaphore, #tpu.memory_space<semaphore_mem>>
    tpu.enqueue_dma source(%123 : memref<1x16xf32, #tpu.memory_space<any>>) target(%124 : memref<1x16xf32, #tpu.memory_space<vmem>>) target_semaphore(%126 : memref<!tpu.dma_semaphore, #tpu.memory_space<semaphore_mem>>)
    %c14_i32 = arith.constant 14 : i32
    %127 = arith.addi %0, %c14_i32 : i32
    %128 = arith.index_cast %127 : i32 to index
    %129 = memref.load %arg1[%128] : memref<32xi32, #tpu.memory_space<smem>>
    %c2_66 = arith.constant 2 : index
    %130 = memref.load %arg2[%c2_66] : memref<4xi32, #tpu.memory_space<smem>>
    %131 = arith.addi %129, %130 : i32
    %c14_i32_67 = arith.constant 14 : i32
    %c0_i32_68 = arith.constant 0 : i32
    %132 = tpu.memref_slice %arg3[%131, %c0_i32_68] : memref<100x16xf32, #tpu.memory_space<any>> -> memref<1x16xf32, #tpu.memory_space<any>>
    %c14_i32_69 = arith.constant 14 : i32
    %c0_i32_70 = arith.constant 0 : i32
    %133 = tpu.memref_slice %arg5[%c14_i32_69, %c0_i32_70] : memref<32x16xf32, #tpu.memory_space<vmem>> -> memref<1x16xf32, #tpu.memory_space<vmem>>
    %134 = tpu.memref_slice %arg6[%c14_i32_67] : memref<32x!tpu.dma_semaphore, #tpu.memory_space<semaphore_mem>> -> memref<1x!tpu.dma_semaphore, #tpu.memory_space<semaphore_mem>>
    %135 = tpu.memref_squeeze %134 : memref<1x!tpu.dma_semaphore, #tpu.memory_space<semaphore_mem>> -> memref<!tpu.dma_semaphore, #tpu.memory_space<semaphore_mem>>
    tpu.enqueue_dma source(%132 : memref<1x16xf32, #tpu.memory_space<any>>) target(%133 : memref<1x16xf32, #tpu.memory_space<vmem>>) target_semaphore(%135 : memref<!tpu.dma_semaphore, #tpu.memory_space<semaphore_mem>>)
    %c15_i32 = arith.constant 15 : i32
    %136 = arith.addi %0, %c15_i32 : i32
    %137 = arith.index_cast %136 : i32 to index
    %138 = memref.load %arg1[%137] : memref<32xi32, #tpu.memory_space<smem>>
    %c3_71 = arith.constant 3 : index
    %139 = memref.load %arg2[%c3_71] : memref<4xi32, #tpu.memory_space<smem>>
    %140 = arith.addi %138, %139 : i32
    %c15_i32_72 = arith.constant 15 : i32
    %c0_i32_73 = arith.constant 0 : i32
    %141 = tpu.memref_slice %arg3[%140, %c0_i32_73] : memref<100x16xf32, #tpu.memory_space<any>> -> memref<1x16xf32, #tpu.memory_space<any>>
    %c15_i32_74 = arith.constant 15 : i32
    %c0_i32_75 = arith.constant 0 : i32
    %142 = tpu.memref_slice %arg5[%c15_i32_74, %c0_i32_75] : memref<32x16xf32, #tpu.memory_space<vmem>> -> memref<1x16xf32, #tpu.memory_space<vmem>>
    %143 = tpu.memref_slice %arg6[%c15_i32_72] : memref<32x!tpu.dma_semaphore, #tpu.memory_space<semaphore_mem>> -> memref<1x!tpu.dma_semaphore, #tpu.memory_space<semaphore_mem>>
    %144 = tpu.memref_squeeze %143 : memref<1x!tpu.dma_semaphore, #tpu.memory_space<semaphore_mem>> -> memref<!tpu.dma_semaphore, #tpu.memory_space<semaphore_mem>>
    tpu.enqueue_dma source(%141 : memref<1x16xf32, #tpu.memory_space<any>>) target(%142 : memref<1x16xf32, #tpu.memory_space<vmem>>) target_semaphore(%144 : memref<!tpu.dma_semaphore, #tpu.memory_space<semaphore_mem>>)
    %c16_i32 = arith.constant 16 : i32
    %145 = arith.addi %0, %c16_i32 : i32
    %146 = arith.index_cast %145 : i32 to index
    %147 = memref.load %arg1[%146] : memref<32xi32, #tpu.memory_space<smem>>
    %c0_76 = arith.constant 0 : index
    %148 = memref.load %arg2[%c0_76] : memref<4xi32, #tpu.memory_space<smem>>
    %149 = arith.addi %147, %148 : i32
    %c16_i32_77 = arith.constant 16 : i32
    %c0_i32_78 = arith.constant 0 : i32
    %150 = tpu.memref_slice %arg3[%149, %c0_i32_78] : memref<100x16xf32, #tpu.memory_space<any>> -> memref<1x16xf32, #tpu.memory_space<any>>
    %c16_i32_79 = arith.constant 16 : i32
    %c0_i32_80 = arith.constant 0 : i32
    %151 = tpu.memref_slice %arg5[%c16_i32_79, %c0_i32_80] : memref<32x16xf32, #tpu.memory_space<vmem>> -> memref<1x16xf32, #tpu.memory_space<vmem>>
    %152 = tpu.memref_slice %arg6[%c16_i32_77] : memref<32x!tpu.dma_semaphore, #tpu.memory_space<semaphore_mem>> -> memref<1x!tpu.dma_semaphore, #tpu.memory_space<semaphore_mem>>
    %153 = tpu.memref_squeeze %152 : memref<1x!tpu.dma_semaphore, #tpu.memory_space<semaphore_mem>> -> memref<!tpu.dma_semaphore, #tpu.memory_space<semaphore_mem>>
    tpu.enqueue_dma source(%150 : memref<1x16xf32, #tpu.memory_space<any>>) target(%151 : memref<1x16xf32, #tpu.memory_space<vmem>>) target_semaphore(%153 : memref<!tpu.dma_semaphore, #tpu.memory_space<semaphore_mem>>)
    %c17_i32 = arith.constant 17 : i32
    %154 = arith.addi %0, %c17_i32 : i32
    %155 = arith.index_cast %154 : i32 to index
    %156 = memref.load %arg1[%155] : memref<32xi32, #tpu.memory_space<smem>>
    %c1_81 = arith.constant 1 : index
    %157 = memref.load %arg2[%c1_81] : memref<4xi32, #tpu.memory_space<smem>>
    %158 = arith.addi %156, %157 : i32
    %c17_i32_82 = arith.constant 17 : i32
    %c0_i32_83 = arith.constant 0 : i32
    %159 = tpu.memref_slice %arg3[%158, %c0_i32_83] : memref<100x16xf32, #tpu.memory_space<any>> -> memref<1x16xf32, #tpu.memory_space<any>>
    %c17_i32_84 = arith.constant 17 : i32
    %c0_i32_85 = arith.constant 0 : i32
    %160 = tpu.memref_slice %arg5[%c17_i32_84, %c0_i32_85] : memref<32x16xf32, #tpu.memory_space<vmem>> -> memref<1x16xf32, #tpu.memory_space<vmem>>
    %161 = tpu.memref_slice %arg6[%c17_i32_82] : memref<32x!tpu.dma_semaphore, #tpu.memory_space<semaphore_mem>> -> memref<1x!tpu.dma_semaphore, #tpu.memory_space<semaphore_mem>>
    %162 = tpu.memref_squeeze %161 : memref<1x!tpu.dma_semaphore, #tpu.memory_space<semaphore_mem>> -> memref<!tpu.dma_semaphore, #tpu.memory_space<semaphore_mem>>
    tpu.enqueue_dma source(%159 : memref<1x16xf32, #tpu.memory_space<any>>) target(%160 : memref<1x16xf32, #tpu.memory_space<vmem>>) target_semaphore(%162 : memref<!tpu.dma_semaphore, #tpu.memory_space<semaphore_mem>>)
    %c18_i32 = arith.constant 18 : i32
    %163 = arith.addi %0, %c18_i32 : i32
    %164 = arith.index_cast %163 : i32 to index
    %165 = memref.load %arg1[%164] : memref<32xi32, #tpu.memory_space<smem>>
    %c2_86 = arith.constant 2 : index
    %166 = memref.load %arg2[%c2_86] : memref<4xi32, #tpu.memory_space<smem>>
    %167 = arith.addi %165, %166 : i32
    %c18_i32_87 = arith.constant 18 : i32
    %c0_i32_88 = arith.constant 0 : i32
    %168 = tpu.memref_slice %arg3[%167, %c0_i32_88] : memref<100x16xf32, #tpu.memory_space<any>> -> memref<1x16xf32, #tpu.memory_space<any>>
    %c18_i32_89 = arith.constant 18 : i32
    %c0_i32_90 = arith.constant 0 : i32
    %169 = tpu.memref_slice %arg5[%c18_i32_89, %c0_i32_90] : memref<32x16xf32, #tpu.memory_space<vmem>> -> memref<1x16xf32, #tpu.memory_space<vmem>>
    %170 = tpu.memref_slice %arg6[%c18_i32_87] : memref<32x!tpu.dma_semaphore, #tpu.memory_space<semaphore_mem>> -> memref<1x!tpu.dma_semaphore, #tpu.memory_space<semaphore_mem>>
    %171 = tpu.memref_squeeze %170 : memref<1x!tpu.dma_semaphore, #tpu.memory_space<semaphore_mem>> -> memref<!tpu.dma_semaphore, #tpu.memory_space<semaphore_mem>>
    tpu.enqueue_dma source(%168 : memref<1x16xf32, #tpu.memory_space<any>>) target(%169 : memref<1x16xf32, #tpu.memory_space<vmem>>) target_semaphore(%171 : memref<!tpu.dma_semaphore, #tpu.memory_space<semaphore_mem>>)
    %c19_i32 = arith.constant 19 : i32
    %172 = arith.addi %0, %c19_i32 : i32
    %173 = arith.index_cast %172 : i32 to index
    %174 = memref.load %arg1[%173] : memref<32xi32, #tpu.memory_space<smem>>
    %c3_91 = arith.constant 3 : index
    %175 = memref.load %arg2[%c3_91] : memref<4xi32, #tpu.memory_space<smem>>
    %176 = arith.addi %174, %175 : i32
    %c19_i32_92 = arith.constant 19 : i32
    %c0_i32_93 = arith.constant 0 : i32
    %177 = tpu.memref_slice %arg3[%176, %c0_i32_93] : memref<100x16xf32, #tpu.memory_space<any>> -> memref<1x16xf32, #tpu.memory_space<any>>
    %c19_i32_94 = arith.constant 19 : i32
    %c0_i32_95 = arith.constant 0 : i32
    %178 = tpu.memref_slice %arg5[%c19_i32_94, %c0_i32_95] : memref<32x16xf32, #tpu.memory_space<vmem>> -> memref<1x16xf32, #tpu.memory_space<vmem>>
    %179 = tpu.memref_slice %arg6[%c19_i32_92] : memref<32x!tpu.dma_semaphore, #tpu.memory_space<semaphore_mem>> -> memref<1x!tpu.dma_semaphore, #tpu.memory_space<semaphore_mem>>
    %180 = tpu.memref_squeeze %179 : memref<1x!tpu.dma_semaphore, #tpu.memory_space<semaphore_mem>> -> memref<!tpu.dma_semaphore, #tpu.memory_space<semaphore_mem>>
    tpu.enqueue_dma source(%177 : memref<1x16xf32, #tpu.memory_space<any>>) target(%178 : memref<1x16xf32, #tpu.memory_space<vmem>>) target_semaphore(%180 : memref<!tpu.dma_semaphore, #tpu.memory_space<semaphore_mem>>)
    %c20_i32 = arith.constant 20 : i32
    %181 = arith.addi %0, %c20_i32 : i32
    %182 = arith.index_cast %181 : i32 to index
    %183 = memref.load %arg1[%182] : memref<32xi32, #tpu.memory_space<smem>>
    %c0_96 = arith.constant 0 : index
    %184 = memref.load %arg2[%c0_96] : memref<4xi32, #tpu.memory_space<smem>>
    %185 = arith.addi %183, %184 : i32
    %c20_i32_97 = arith.constant 20 : i32
    %c0_i32_98 = arith.constant 0 : i32
    %186 = tpu.memref_slice %arg3[%185, %c0_i32_98] : memref<100x16xf32, #tpu.memory_space<any>> -> memref<1x16xf32, #tpu.memory_space<any>>
    %c20_i32_99 = arith.constant 20 : i32
    %c0_i32_100 = arith.constant 0 : i32
    %187 = tpu.memref_slice %arg5[%c20_i32_99, %c0_i32_100] : memref<32x16xf32, #tpu.memory_space<vmem>> -> memref<1x16xf32, #tpu.memory_space<vmem>>
    %188 = tpu.memref_slice %arg6[%c20_i32_97] : memref<32x!tpu.dma_semaphore, #tpu.memory_space<semaphore_mem>> -> memref<1x!tpu.dma_semaphore, #tpu.memory_space<semaphore_mem>>
    %189 = tpu.memref_squeeze %188 : memref<1x!tpu.dma_semaphore, #tpu.memory_space<semaphore_mem>> -> memref<!tpu.dma_semaphore, #tpu.memory_space<semaphore_mem>>
    tpu.enqueue_dma source(%186 : memref<1x16xf32, #tpu.memory_space<any>>) target(%187 : memref<1x16xf32, #tpu.memory_space<vmem>>) target_semaphore(%189 : memref<!tpu.dma_semaphore, #tpu.memory_space<semaphore_mem>>)
    %c21_i32 = arith.constant 21 : i32
    %190 = arith.addi %0, %c21_i32 : i32
    %191 = arith.index_cast %190 : i32 to index
    %192 = memref.load %arg1[%191] : memref<32xi32, #tpu.memory_space<smem>>
    %c1_101 = arith.constant 1 : index
    %193 = memref.load %arg2[%c1_101] : memref<4xi32, #tpu.memory_space<smem>>
    %194 = arith.addi %192, %193 : i32
    %c21_i32_102 = arith.constant 21 : i32
    %c0_i32_103 = arith.constant 0 : i32
    %195 = tpu.memref_slice %arg3[%194, %c0_i32_103] : memref<100x16xf32, #tpu.memory_space<any>> -> memref<1x16xf32, #tpu.memory_space<any>>
    %c21_i32_104 = arith.constant 21 : i32
    %c0_i32_105 = arith.constant 0 : i32
    %196 = tpu.memref_slice %arg5[%c21_i32_104, %c0_i32_105] : memref<32x16xf32, #tpu.memory_space<vmem>> -> memref<1x16xf32, #tpu.memory_space<vmem>>
    %197 = tpu.memref_slice %arg6[%c21_i32_102] : memref<32x!tpu.dma_semaphore, #tpu.memory_space<semaphore_mem>> -> memref<1x!tpu.dma_semaphore, #tpu.memory_space<semaphore_mem>>
    %198 = tpu.memref_squeeze %197 : memref<1x!tpu.dma_semaphore, #tpu.memory_space<semaphore_mem>> -> memref<!tpu.dma_semaphore, #tpu.memory_space<semaphore_mem>>
    tpu.enqueue_dma source(%195 : memref<1x16xf32, #tpu.memory_space<any>>) target(%196 : memref<1x16xf32, #tpu.memory_space<vmem>>) target_semaphore(%198 : memref<!tpu.dma_semaphore, #tpu.memory_space<semaphore_mem>>)
    %c22_i32 = arith.constant 22 : i32
    %199 = arith.addi %0, %c22_i32 : i32
    %200 = arith.index_cast %199 : i32 to index
    %201 = memref.load %arg1[%200] : memref<32xi32, #tpu.memory_space<smem>>
    %c2_106 = arith.constant 2 : index
    %202 = memref.load %arg2[%c2_106] : memref<4xi32, #tpu.memory_space<smem>>
    %203 = arith.addi %201, %202 : i32
    %c22_i32_107 = arith.constant 22 : i32
    %c0_i32_108 = arith.constant 0 : i32
    %204 = tpu.memref_slice %arg3[%203, %c0_i32_108] : memref<100x16xf32, #tpu.memory_space<any>> -> memref<1x16xf32, #tpu.memory_space<any>>
    %c22_i32_109 = arith.constant 22 : i32
    %c0_i32_110 = arith.constant 0 : i32
    %205 = tpu.memref_slice %arg5[%c22_i32_109, %c0_i32_110] : memref<32x16xf32, #tpu.memory_space<vmem>> -> memref<1x16xf32, #tpu.memory_space<vmem>>
    %206 = tpu.memref_slice %arg6[%c22_i32_107] : memref<32x!tpu.dma_semaphore, #tpu.memory_space<semaphore_mem>> -> memref<1x!tpu.dma_semaphore, #tpu.memory_space<semaphore_mem>>
    %207 = tpu.memref_squeeze %206 : memref<1x!tpu.dma_semaphore, #tpu.memory_space<semaphore_mem>> -> memref<!tpu.dma_semaphore, #tpu.memory_space<semaphore_mem>>
    tpu.enqueue_dma source(%204 : memref<1x16xf32, #tpu.memory_space<any>>) target(%205 : memref<1x16xf32, #tpu.memory_space<vmem>>) target_semaphore(%207 : memref<!tpu.dma_semaphore, #tpu.memory_space<semaphore_mem>>)
    %c23_i32 = arith.constant 23 : i32
    %208 = arith.addi %0, %c23_i32 : i32
    %209 = arith.index_cast %208 : i32 to index
    %210 = memref.load %arg1[%209] : memref<32xi32, #tpu.memory_space<smem>>
    %c3_111 = arith.constant 3 : index
    %211 = memref.load %arg2[%c3_111] : memref<4xi32, #tpu.memory_space<smem>>
    %212 = arith.addi %210, %211 : i32
    %c23_i32_112 = arith.constant 23 : i32
    %c0_i32_113 = arith.constant 0 : i32
    %213 = tpu.memref_slice %arg3[%212, %c0_i32_113] : memref<100x16xf32, #tpu.memory_space<any>> -> memref<1x16xf32, #tpu.memory_space<any>>
    %c23_i32_114 = arith.constant 23 : i32
    %c0_i32_115 = arith.constant 0 : i32
    %214 = tpu.memref_slice %arg5[%c23_i32_114, %c0_i32_115] : memref<32x16xf32, #tpu.memory_space<vmem>> -> memref<1x16xf32, #tpu.memory_space<vmem>>
    %215 = tpu.memref_slice %arg6[%c23_i32_112] : memref<32x!tpu.dma_semaphore, #tpu.memory_space<semaphore_mem>> -> memref<1x!tpu.dma_semaphore, #tpu.memory_space<semaphore_mem>>
    %216 = tpu.memref_squeeze %215 : memref<1x!tpu.dma_semaphore, #tpu.memory_space<semaphore_mem>> -> memref<!tpu.dma_semaphore, #tpu.memory_space<semaphore_mem>>
    tpu.enqueue_dma source(%213 : memref<1x16xf32, #tpu.memory_space<any>>) target(%214 : memref<1x16xf32, #tpu.memory_space<vmem>>) target_semaphore(%216 : memref<!tpu.dma_semaphore, #tpu.memory_space<semaphore_mem>>)
    %c24_i32 = arith.constant 24 : i32
    %217 = arith.addi %0, %c24_i32 : i32
    %218 = arith.index_cast %217 : i32 to index
    %219 = memref.load %arg1[%218] : memref<32xi32, #tpu.memory_space<smem>>
    %c0_116 = arith.constant 0 : index
    %220 = memref.load %arg2[%c0_116] : memref<4xi32, #tpu.memory_space<smem>>
    %221 = arith.addi %219, %220 : i32
    %c24_i32_117 = arith.constant 24 : i32
    %c0_i32_118 = arith.constant 0 : i32
    %222 = tpu.memref_slice %arg3[%221, %c0_i32_118] : memref<100x16xf32, #tpu.memory_space<any>> -> memref<1x16xf32, #tpu.memory_space<any>>
    %c24_i32_119 = arith.constant 24 : i32
    %c0_i32_120 = arith.constant 0 : i32
    %223 = tpu.memref_slice %arg5[%c24_i32_119, %c0_i32_120] : memref<32x16xf32, #tpu.memory_space<vmem>> -> memref<1x16xf32, #tpu.memory_space<vmem>>
    %224 = tpu.memref_slice %arg6[%c24_i32_117] : memref<32x!tpu.dma_semaphore, #tpu.memory_space<semaphore_mem>> -> memref<1x!tpu.dma_semaphore, #tpu.memory_space<semaphore_mem>>
    %225 = tpu.memref_squeeze %224 : memref<1x!tpu.dma_semaphore, #tpu.memory_space<semaphore_mem>> -> memref<!tpu.dma_semaphore, #tpu.memory_space<semaphore_mem>>
    tpu.enqueue_dma source(%222 : memref<1x16xf32, #tpu.memory_space<any>>) target(%223 : memref<1x16xf32, #tpu.memory_space<vmem>>) target_semaphore(%225 : memref<!tpu.dma_semaphore, #tpu.memory_space<semaphore_mem>>)
    %c25_i32 = arith.constant 25 : i32
    %226 = arith.addi %0, %c25_i32 : i32
    %227 = arith.index_cast %226 : i32 to index
    %228 = memref.load %arg1[%227] : memref<32xi32, #tpu.memory_space<smem>>
    %c1_121 = arith.constant 1 : index
    %229 = memref.load %arg2[%c1_121] : memref<4xi32, #tpu.memory_space<smem>>
    %230 = arith.addi %228, %229 : i32
    %c25_i32_122 = arith.constant 25 : i32
    %c0_i32_123 = arith.constant 0 : i32
    %231 = tpu.memref_slice %arg3[%230, %c0_i32_123] : memref<100x16xf32, #tpu.memory_space<any>> -> memref<1x16xf32, #tpu.memory_space<any>>
    %c25_i32_124 = arith.constant 25 : i32
    %c0_i32_125 = arith.constant 0 : i32
    %232 = tpu.memref_slice %arg5[%c25_i32_124, %c0_i32_125] : memref<32x16xf32, #tpu.memory_space<vmem>> -> memref<1x16xf32, #tpu.memory_space<vmem>>
    %233 = tpu.memref_slice %arg6[%c25_i32_122] : memref<32x!tpu.dma_semaphore, #tpu.memory_space<semaphore_mem>> -> memref<1x!tpu.dma_semaphore, #tpu.memory_space<semaphore_mem>>
    %234 = tpu.memref_squeeze %233 : memref<1x!tpu.dma_semaphore, #tpu.memory_space<semaphore_mem>> -> memref<!tpu.dma_semaphore, #tpu.memory_space<semaphore_mem>>
    tpu.enqueue_dma source(%231 : memref<1x16xf32, #tpu.memory_space<any>>) target(%232 : memref<1x16xf32, #tpu.memory_space<vmem>>) target_semaphore(%234 : memref<!tpu.dma_semaphore, #tpu.memory_space<semaphore_mem>>)
    %c26_i32 = arith.constant 26 : i32
    %235 = arith.addi %0, %c26_i32 : i32
    %236 = arith.index_cast %235 : i32 to index
    %237 = memref.load %arg1[%236] : memref<32xi32, #tpu.memory_space<smem>>
    %c2_126 = arith.constant 2 : index
    %238 = memref.load %arg2[%c2_126] : memref<4xi32, #tpu.memory_space<smem>>
    %239 = arith.addi %237, %238 : i32
    %c26_i32_127 = arith.constant 26 : i32
    %c0_i32_128 = arith.constant 0 : i32
    %240 = tpu.memref_slice %arg3[%239, %c0_i32_128] : memref<100x16xf32, #tpu.memory_space<any>> -> memref<1x16xf32, #tpu.memory_space<any>>
    %c26_i32_129 = arith.constant 26 : i32
    %c0_i32_130 = arith.constant 0 : i32
    %241 = tpu.memref_slice %arg5[%c26_i32_129, %c0_i32_130] : memref<32x16xf32, #tpu.memory_space<vmem>> -> memref<1x16xf32, #tpu.memory_space<vmem>>
    %242 = tpu.memref_slice %arg6[%c26_i32_127] : memref<32x!tpu.dma_semaphore, #tpu.memory_space<semaphore_mem>> -> memref<1x!tpu.dma_semaphore, #tpu.memory_space<semaphore_mem>>
    %243 = tpu.memref_squeeze %242 : memref<1x!tpu.dma_semaphore, #tpu.memory_space<semaphore_mem>> -> memref<!tpu.dma_semaphore, #tpu.memory_space<semaphore_mem>>
    tpu.enqueue_dma source(%240 : memref<1x16xf32, #tpu.memory_space<any>>) target(%241 : memref<1x16xf32, #tpu.memory_space<vmem>>) target_semaphore(%243 : memref<!tpu.dma_semaphore, #tpu.memory_space<semaphore_mem>>)
    %c27_i32 = arith.constant 27 : i32
    %244 = arith.addi %0, %c27_i32 : i32
    %245 = arith.index_cast %244 : i32 to index
    %246 = memref.load %arg1[%245] : memref<32xi32, #tpu.memory_space<smem>>
    %c3_131 = arith.constant 3 : index
    %247 = memref.load %arg2[%c3_131] : memref<4xi32, #tpu.memory_space<smem>>
    %248 = arith.addi %246, %247 : i32
    %c27_i32_132 = arith.constant 27 : i32
    %c0_i32_133 = arith.constant 0 : i32
    %249 = tpu.memref_slice %arg3[%248, %c0_i32_133] : memref<100x16xf32, #tpu.memory_space<any>> -> memref<1x16xf32, #tpu.memory_space<any>>
    %c27_i32_134 = arith.constant 27 : i32
    %c0_i32_135 = arith.constant 0 : i32
    %250 = tpu.memref_slice %arg5[%c27_i32_134, %c0_i32_135] : memref<32x16xf32, #tpu.memory_space<vmem>> -> memref<1x16xf32, #tpu.memory_space<vmem>>
    %251 = tpu.memref_slice %arg6[%c27_i32_132] : memref<32x!tpu.dma_semaphore, #tpu.memory_space<semaphore_mem>> -> memref<1x!tpu.dma_semaphore, #tpu.memory_space<semaphore_mem>>
    %252 = tpu.memref_squeeze %251 : memref<1x!tpu.dma_semaphore, #tpu.memory_space<semaphore_mem>> -> memref<!tpu.dma_semaphore, #tpu.memory_space<semaphore_mem>>
    tpu.enqueue_dma source(%249 : memref<1x16xf32, #tpu.memory_space<any>>) target(%250 : memref<1x16xf32, #tpu.memory_space<vmem>>) target_semaphore(%252 : memref<!tpu.dma_semaphore, #tpu.memory_space<semaphore_mem>>)
    %c28_i32 = arith.constant 28 : i32
    %253 = arith.addi %0, %c28_i32 : i32
    %254 = arith.index_cast %253 : i32 to index
    %255 = memref.load %arg1[%254] : memref<32xi32, #tpu.memory_space<smem>>
    %c0_136 = arith.constant 0 : index
    %256 = memref.load %arg2[%c0_136] : memref<4xi32, #tpu.memory_space<smem>>
    %257 = arith.addi %255, %256 : i32
    %c28_i32_137 = arith.constant 28 : i32
    %c0_i32_138 = arith.constant 0 : i32
    %258 = tpu.memref_slice %arg3[%257, %c0_i32_138] : memref<100x16xf32, #tpu.memory_space<any>> -> memref<1x16xf32, #tpu.memory_space<any>>
    %c28_i32_139 = arith.constant 28 : i32
    %c0_i32_140 = arith.constant 0 : i32
    %259 = tpu.memref_slice %arg5[%c28_i32_139, %c0_i32_140] : memref<32x16xf32, #tpu.memory_space<vmem>> -> memref<1x16xf32, #tpu.memory_space<vmem>>
    %260 = tpu.memref_slice %arg6[%c28_i32_137] : memref<32x!tpu.dma_semaphore, #tpu.memory_space<semaphore_mem>> -> memref<1x!tpu.dma_semaphore, #tpu.memory_space<semaphore_mem>>
    %261 = tpu.memref_squeeze %260 : memref<1x!tpu.dma_semaphore, #tpu.memory_space<semaphore_mem>> -> memref<!tpu.dma_semaphore, #tpu.memory_space<semaphore_mem>>
    tpu.enqueue_dma source(%258 : memref<1x16xf32, #tpu.memory_space<any>>) target(%259 : memref<1x16xf32, #tpu.memory_space<vmem>>) target_semaphore(%261 : memref<!tpu.dma_semaphore, #tpu.memory_space<semaphore_mem>>)
    %c29_i32 = arith.constant 29 : i32
    %262 = arith.addi %0, %c29_i32 : i32
    %263 = arith.index_cast %262 : i32 to index
    %264 = memref.load %arg1[%263] : memref<32xi32, #tpu.memory_space<smem>>
    %c1_141 = arith.constant 1 : index
    %265 = memref.load %arg2[%c1_141] : memref<4xi32, #tpu.memory_space<smem>>
    %266 = arith.addi %264, %265 : i32
    %c29_i32_142 = arith.constant 29 : i32
    %c0_i32_143 = arith.constant 0 : i32
    %267 = tpu.memref_slice %arg3[%266, %c0_i32_143] : memref<100x16xf32, #tpu.memory_space<any>> -> memref<1x16xf32, #tpu.memory_space<any>>
    %c29_i32_144 = arith.constant 29 : i32
    %c0_i32_145 = arith.constant 0 : i32
    %268 = tpu.memref_slice %arg5[%c29_i32_144, %c0_i32_145] : memref<32x16xf32, #tpu.memory_space<vmem>> -> memref<1x16xf32, #tpu.memory_space<vmem>>
    %269 = tpu.memref_slice %arg6[%c29_i32_142] : memref<32x!tpu.dma_semaphore, #tpu.memory_space<semaphore_mem>> -> memref<1x!tpu.dma_semaphore, #tpu.memory_space<semaphore_mem>>
    %270 = tpu.memref_squeeze %269 : memref<1x!tpu.dma_semaphore, #tpu.memory_space<semaphore_mem>> -> memref<!tpu.dma_semaphore, #tpu.memory_space<semaphore_mem>>
    tpu.enqueue_dma source(%267 : memref<1x16xf32, #tpu.memory_space<any>>) target(%268 : memref<1x16xf32, #tpu.memory_space<vmem>>) target_semaphore(%270 : memref<!tpu.dma_semaphore, #tpu.memory_space<semaphore_mem>>)
    %c30_i32 = arith.constant 30 : i32
    %271 = arith.addi %0, %c30_i32 : i32
    %272 = arith.index_cast %271 : i32 to index
    %273 = memref.load %arg1[%272] : memref<32xi32, #tpu.memory_space<smem>>
    %c2_146 = arith.constant 2 : index
    %274 = memref.load %arg2[%c2_146] : memref<4xi32, #tpu.memory_space<smem>>
    %275 = arith.addi %273, %274 : i32
    %c30_i32_147 = arith.constant 30 : i32
    %c0_i32_148 = arith.constant 0 : i32
    %276 = tpu.memref_slice %arg3[%275, %c0_i32_148] : memref<100x16xf32, #tpu.memory_space<any>> -> memref<1x16xf32, #tpu.memory_space<any>>
    %c30_i32_149 = arith.constant 30 : i32
    %c0_i32_150 = arith.constant 0 : i32
    %277 = tpu.memref_slice %arg5[%c30_i32_149, %c0_i32_150] : memref<32x16xf32, #tpu.memory_space<vmem>> -> memref<1x16xf32, #tpu.memory_space<vmem>>
    %278 = tpu.memref_slice %arg6[%c30_i32_147] : memref<32x!tpu.dma_semaphore, #tpu.memory_space<semaphore_mem>> -> memref<1x!tpu.dma_semaphore, #tpu.memory_space<semaphore_mem>>
    %279 = tpu.memref_squeeze %278 : memref<1x!tpu.dma_semaphore, #tpu.memory_space<semaphore_mem>> -> memref<!tpu.dma_semaphore, #tpu.memory_space<semaphore_mem>>
    tpu.enqueue_dma source(%276 : memref<1x16xf32, #tpu.memory_space<any>>) target(%277 : memref<1x16xf32, #tpu.memory_space<vmem>>) target_semaphore(%279 : memref<!tpu.dma_semaphore, #tpu.memory_space<semaphore_mem>>)
    %c31_i32 = arith.constant 31 : i32
    %280 = arith.addi %0, %c31_i32 : i32
    %281 = arith.index_cast %280 : i32 to index
    %282 = memref.load %arg1[%281] : memref<32xi32, #tpu.memory_space<smem>>
    %c3_151 = arith.constant 3 : index
    %283 = memref.load %arg2[%c3_151] : memref<4xi32, #tpu.memory_space<smem>>
    %284 = arith.addi %282, %283 : i32
    %c31_i32_152 = arith.constant 31 : i32
    %c0_i32_153 = arith.constant 0 : i32
    %285 = tpu.memref_slice %arg3[%284, %c0_i32_153] : memref<100x16xf32, #tpu.memory_space<any>> -> memref<1x16xf32, #tpu.memory_space<any>>
    %c31_i32_154 = arith.constant 31 : i32
    %c0_i32_155 = arith.constant 0 : i32
    %286 = tpu.memref_slice %arg5[%c31_i32_154, %c0_i32_155] : memref<32x16xf32, #tpu.memory_space<vmem>> -> memref<1x16xf32, #tpu.memory_space<vmem>>
    %287 = tpu.memref_slice %arg6[%c31_i32_152] : memref<32x!tpu.dma_semaphore, #tpu.memory_space<semaphore_mem>> -> memref<1x!tpu.dma_semaphore, #tpu.memory_space<semaphore_mem>>
    %288 = tpu.memref_squeeze %287 : memref<1x!tpu.dma_semaphore, #tpu.memory_space<semaphore_mem>> -> memref<!tpu.dma_semaphore, #tpu.memory_space<semaphore_mem>>
    tpu.enqueue_dma source(%285 : memref<1x16xf32, #tpu.memory_space<any>>) target(%286 : memref<1x16xf32, #tpu.memory_space<vmem>>) target_semaphore(%288 : memref<!tpu.dma_semaphore, #tpu.memory_space<semaphore_mem>>)
    %c0_i32_156 = arith.constant 0 : i32
    %c0_i32_157 = arith.constant 0 : i32
    %289 = tpu.memref_slice %arg3[%5, %c0_i32_157] : memref<100x16xf32, #tpu.memory_space<any>> -> memref<1x16xf32, #tpu.memory_space<any>>
    %c0_i32_158 = arith.constant 0 : i32
    %c0_i32_159 = arith.constant 0 : i32
    %290 = tpu.memref_slice %arg5[%c0_i32_158, %c0_i32_159] : memref<32x16xf32, #tpu.memory_space<vmem>> -> memref<1x16xf32, #tpu.memory_space<vmem>>
    %291 = tpu.memref_slice %arg6[%c0_i32_156] : memref<32x!tpu.dma_semaphore, #tpu.memory_space<semaphore_mem>> -> memref<1x!tpu.dma_semaphore, #tpu.memory_space<semaphore_mem>>
    %292 = tpu.memref_squeeze %291 : memref<1x!tpu.dma_semaphore, #tpu.memory_space<semaphore_mem>> -> memref<!tpu.dma_semaphore, #tpu.memory_space<semaphore_mem>>
    tpu.wait_dma2 semaphore(%292 : memref<!tpu.dma_semaphore, #tpu.memory_space<semaphore_mem>>) src(%289 : memref<1x16xf32, #tpu.memory_space<any>>) dst(%290 : memref<1x16xf32, #tpu.memory_space<vmem>>)
    %c1_i32_160 = arith.constant 1 : i32
    %c0_i32_161 = arith.constant 0 : i32
    %293 = tpu.memref_slice %arg3[%14, %c0_i32_161] : memref<100x16xf32, #tpu.memory_space<any>> -> memref<1x16xf32, #tpu.memory_space<any>>
    %c1_i32_162 = arith.constant 1 : i32
    %c0_i32_163 = arith.constant 0 : i32
    %294 = tpu.memref_slice %arg5[%c1_i32_162, %c0_i32_163] : memref<32x16xf32, #tpu.memory_space<vmem>> -> memref<1x16xf32, #tpu.memory_space<vmem>>
    %295 = tpu.memref_slice %arg6[%c1_i32_160] : memref<32x!tpu.dma_semaphore, #tpu.memory_space<semaphore_mem>> -> memref<1x!tpu.dma_semaphore, #tpu.memory_space<semaphore_mem>>
    %296 = tpu.memref_squeeze %295 : memref<1x!tpu.dma_semaphore, #tpu.memory_space<semaphore_mem>> -> memref<!tpu.dma_semaphore, #tpu.memory_space<semaphore_mem>>
    tpu.wait_dma2 semaphore(%296 : memref<!tpu.dma_semaphore, #tpu.memory_space<semaphore_mem>>) src(%293 : memref<1x16xf32, #tpu.memory_space<any>>) dst(%294 : memref<1x16xf32, #tpu.memory_space<vmem>>)
    %c2_i32_164 = arith.constant 2 : i32
    %c0_i32_165 = arith.constant 0 : i32
    %297 = tpu.memref_slice %arg3[%23, %c0_i32_165] : memref<100x16xf32, #tpu.memory_space<any>> -> memref<1x16xf32, #tpu.memory_space<any>>
    %c2_i32_166 = arith.constant 2 : i32
    %c0_i32_167 = arith.constant 0 : i32
    %298 = tpu.memref_slice %arg5[%c2_i32_166, %c0_i32_167] : memref<32x16xf32, #tpu.memory_space<vmem>> -> memref<1x16xf32, #tpu.memory_space<vmem>>
    %299 = tpu.memref_slice %arg6[%c2_i32_164] : memref<32x!tpu.dma_semaphore, #tpu.memory_space<semaphore_mem>> -> memref<1x!tpu.dma_semaphore, #tpu.memory_space<semaphore_mem>>
    %300 = tpu.memref_squeeze %299 : memref<1x!tpu.dma_semaphore, #tpu.memory_space<semaphore_mem>> -> memref<!tpu.dma_semaphore, #tpu.memory_space<semaphore_mem>>
    tpu.wait_dma2 semaphore(%300 : memref<!tpu.dma_semaphore, #tpu.memory_space<semaphore_mem>>) src(%297 : memref<1x16xf32, #tpu.memory_space<any>>) dst(%298 : memref<1x16xf32, #tpu.memory_space<vmem>>)
    %c3_i32_168 = arith.constant 3 : i32
    %c0_i32_169 = arith.constant 0 : i32
    %301 = tpu.memref_slice %arg3[%32, %c0_i32_169] : memref<100x16xf32, #tpu.memory_space<any>> -> memref<1x16xf32, #tpu.memory_space<any>>
    %c3_i32_170 = arith.constant 3 : i32
    %c0_i32_171 = arith.constant 0 : i32
    %302 = tpu.memref_slice %arg5[%c3_i32_170, %c0_i32_171] : memref<32x16xf32, #tpu.memory_space<vmem>> -> memref<1x16xf32, #tpu.memory_space<vmem>>
    %303 = tpu.memref_slice %arg6[%c3_i32_168] : memref<32x!tpu.dma_semaphore, #tpu.memory_space<semaphore_mem>> -> memref<1x!tpu.dma_semaphore, #tpu.memory_space<semaphore_mem>>
    %304 = tpu.memref_squeeze %303 : memref<1x!tpu.dma_semaphore, #tpu.memory_space<semaphore_mem>> -> memref<!tpu.dma_semaphore, #tpu.memory_space<semaphore_mem>>
    tpu.wait_dma2 semaphore(%304 : memref<!tpu.dma_semaphore, #tpu.memory_space<semaphore_mem>>) src(%301 : memref<1x16xf32, #tpu.memory_space<any>>) dst(%302 : memref<1x16xf32, #tpu.memory_space<vmem>>)
    %c4_i32_172 = arith.constant 4 : i32
    %c0_i32_173 = arith.constant 0 : i32
    %305 = tpu.memref_slice %arg3[%41, %c0_i32_173] : memref<100x16xf32, #tpu.memory_space<any>> -> memref<1x16xf32, #tpu.memory_space<any>>
    %c4_i32_174 = arith.constant 4 : i32
    %c0_i32_175 = arith.constant 0 : i32
    %306 = tpu.memref_slice %arg5[%c4_i32_174, %c0_i32_175] : memref<32x16xf32, #tpu.memory_space<vmem>> -> memref<1x16xf32, #tpu.memory_space<vmem>>
    %307 = tpu.memref_slice %arg6[%c4_i32_172] : memref<32x!tpu.dma_semaphore, #tpu.memory_space<semaphore_mem>> -> memref<1x!tpu.dma_semaphore, #tpu.memory_space<semaphore_mem>>
    %308 = tpu.memref_squeeze %307 : memref<1x!tpu.dma_semaphore, #tpu.memory_space<semaphore_mem>> -> memref<!tpu.dma_semaphore, #tpu.memory_space<semaphore_mem>>
    tpu.wait_dma2 semaphore(%308 : memref<!tpu.dma_semaphore, #tpu.memory_space<semaphore_mem>>) src(%305 : memref<1x16xf32, #tpu.memory_space<any>>) dst(%306 : memref<1x16xf32, #tpu.memory_space<vmem>>)
    %c5_i32_176 = arith.constant 5 : i32
    %c0_i32_177 = arith.constant 0 : i32
    %309 = tpu.memref_slice %arg3[%50, %c0_i32_177] : memref<100x16xf32, #tpu.memory_space<any>> -> memref<1x16xf32, #tpu.memory_space<any>>
    %c5_i32_178 = arith.constant 5 : i32
    %c0_i32_179 = arith.constant 0 : i32
    %310 = tpu.memref_slice %arg5[%c5_i32_178, %c0_i32_179] : memref<32x16xf32, #tpu.memory_space<vmem>> -> memref<1x16xf32, #tpu.memory_space<vmem>>
    %311 = tpu.memref_slice %arg6[%c5_i32_176] : memref<32x!tpu.dma_semaphore, #tpu.memory_space<semaphore_mem>> -> memref<1x!tpu.dma_semaphore, #tpu.memory_space<semaphore_mem>>
    %312 = tpu.memref_squeeze %311 : memref<1x!tpu.dma_semaphore, #tpu.memory_space<semaphore_mem>> -> memref<!tpu.dma_semaphore, #tpu.memory_space<semaphore_mem>>
    tpu.wait_dma2 semaphore(%312 : memref<!tpu.dma_semaphore, #tpu.memory_space<semaphore_mem>>) src(%309 : memref<1x16xf32, #tpu.memory_space<any>>) dst(%310 : memref<1x16xf32, #tpu.memory_space<vmem>>)
    %c6_i32_180 = arith.constant 6 : i32
    %c0_i32_181 = arith.constant 0 : i32
    %313 = tpu.memref_slice %arg3[%59, %c0_i32_181] : memref<100x16xf32, #tpu.memory_space<any>> -> memref<1x16xf32, #tpu.memory_space<any>>
    %c6_i32_182 = arith.constant 6 : i32
    %c0_i32_183 = arith.constant 0 : i32
    %314 = tpu.memref_slice %arg5[%c6_i32_182, %c0_i32_183] : memref<32x16xf32, #tpu.memory_space<vmem>> -> memref<1x16xf32, #tpu.memory_space<vmem>>
    %315 = tpu.memref_slice %arg6[%c6_i32_180] : memref<32x!tpu.dma_semaphore, #tpu.memory_space<semaphore_mem>> -> memref<1x!tpu.dma_semaphore, #tpu.memory_space<semaphore_mem>>
    %316 = tpu.memref_squeeze %315 : memref<1x!tpu.dma_semaphore, #tpu.memory_space<semaphore_mem>> -> memref<!tpu.dma_semaphore, #tpu.memory_space<semaphore_mem>>
    tpu.wait_dma2 semaphore(%316 : memref<!tpu.dma_semaphore, #tpu.memory_space<semaphore_mem>>) src(%313 : memref<1x16xf32, #tpu.memory_space<any>>) dst(%314 : memref<1x16xf32, #tpu.memory_space<vmem>>)
    %c7_i32_184 = arith.constant 7 : i32
    %c0_i32_185 = arith.constant 0 : i32
    %317 = tpu.memref_slice %arg3[%68, %c0_i32_185] : memref<100x16xf32, #tpu.memory_space<any>> -> memref<1x16xf32, #tpu.memory_space<any>>
    %c7_i32_186 = arith.constant 7 : i32
    %c0_i32_187 = arith.constant 0 : i32
    %318 = tpu.memref_slice %arg5[%c7_i32_186, %c0_i32_187] : memref<32x16xf32, #tpu.memory_space<vmem>> -> memref<1x16xf32, #tpu.memory_space<vmem>>
    %319 = tpu.memref_slice %arg6[%c7_i32_184] : memref<32x!tpu.dma_semaphore, #tpu.memory_space<semaphore_mem>> -> memref<1x!tpu.dma_semaphore, #tpu.memory_space<semaphore_mem>>
    %320 = tpu.memref_squeeze %319 : memref<1x!tpu.dma_semaphore, #tpu.memory_space<semaphore_mem>> -> memref<!tpu.dma_semaphore, #tpu.memory_space<semaphore_mem>>
    tpu.wait_dma2 semaphore(%320 : memref<!tpu.dma_semaphore, #tpu.memory_space<semaphore_mem>>) src(%317 : memref<1x16xf32, #tpu.memory_space<any>>) dst(%318 : memref<1x16xf32, #tpu.memory_space<vmem>>)
    %c8_i32_188 = arith.constant 8 : i32
    %c0_i32_189 = arith.constant 0 : i32
    %321 = tpu.memref_slice %arg3[%77, %c0_i32_189] : memref<100x16xf32, #tpu.memory_space<any>> -> memref<1x16xf32, #tpu.memory_space<any>>
    %c8_i32_190 = arith.constant 8 : i32
    %c0_i32_191 = arith.constant 0 : i32
    %322 = tpu.memref_slice %arg5[%c8_i32_190, %c0_i32_191] : memref<32x16xf32, #tpu.memory_space<vmem>> -> memref<1x16xf32, #tpu.memory_space<vmem>>
    %323 = tpu.memref_slice %arg6[%c8_i32_188] : memref<32x!tpu.dma_semaphore, #tpu.memory_space<semaphore_mem>> -> memref<1x!tpu.dma_semaphore, #tpu.memory_space<semaphore_mem>>
    %324 = tpu.memref_squeeze %323 : memref<1x!tpu.dma_semaphore, #tpu.memory_space<semaphore_mem>> -> memref<!tpu.dma_semaphore, #tpu.memory_space<semaphore_mem>>
    tpu.wait_dma2 semaphore(%324 : memref<!tpu.dma_semaphore, #tpu.memory_space<semaphore_mem>>) src(%321 : memref<1x16xf32, #tpu.memory_space<any>>) dst(%322 : memref<1x16xf32, #tpu.memory_space<vmem>>)
    %c9_i32_192 = arith.constant 9 : i32
    %c0_i32_193 = arith.constant 0 : i32
    %325 = tpu.memref_slice %arg3[%86, %c0_i32_193] : memref<100x16xf32, #tpu.memory_space<any>> -> memref<1x16xf32, #tpu.memory_space<any>>
    %c9_i32_194 = arith.constant 9 : i32
    %c0_i32_195 = arith.constant 0 : i32
    %326 = tpu.memref_slice %arg5[%c9_i32_194, %c0_i32_195] : memref<32x16xf32, #tpu.memory_space<vmem>> -> memref<1x16xf32, #tpu.memory_space<vmem>>
    %327 = tpu.memref_slice %arg6[%c9_i32_192] : memref<32x!tpu.dma_semaphore, #tpu.memory_space<semaphore_mem>> -> memref<1x!tpu.dma_semaphore, #tpu.memory_space<semaphore_mem>>
    %328 = tpu.memref_squeeze %327 : memref<1x!tpu.dma_semaphore, #tpu.memory_space<semaphore_mem>> -> memref<!tpu.dma_semaphore, #tpu.memory_space<semaphore_mem>>
    tpu.wait_dma2 semaphore(%328 : memref<!tpu.dma_semaphore, #tpu.memory_space<semaphore_mem>>) src(%325 : memref<1x16xf32, #tpu.memory_space<any>>) dst(%326 : memref<1x16xf32, #tpu.memory_space<vmem>>)
    %c10_i32_196 = arith.constant 10 : i32
    %c0_i32_197 = arith.constant 0 : i32
    %329 = tpu.memref_slice %arg3[%95, %c0_i32_197] : memref<100x16xf32, #tpu.memory_space<any>> -> memref<1x16xf32, #tpu.memory_space<any>>
    %c10_i32_198 = arith.constant 10 : i32
    %c0_i32_199 = arith.constant 0 : i32
    %330 = tpu.memref_slice %arg5[%c10_i32_198, %c0_i32_199] : memref<32x16xf32, #tpu.memory_space<vmem>> -> memref<1x16xf32, #tpu.memory_space<vmem>>
    %331 = tpu.memref_slice %arg6[%c10_i32_196] : memref<32x!tpu.dma_semaphore, #tpu.memory_space<semaphore_mem>> -> memref<1x!tpu.dma_semaphore, #tpu.memory_space<semaphore_mem>>
    %332 = tpu.memref_squeeze %331 : memref<1x!tpu.dma_semaphore, #tpu.memory_space<semaphore_mem>> -> memref<!tpu.dma_semaphore, #tpu.memory_space<semaphore_mem>>
    tpu.wait_dma2 semaphore(%332 : memref<!tpu.dma_semaphore, #tpu.memory_space<semaphore_mem>>) src(%329 : memref<1x16xf32, #tpu.memory_space<any>>) dst(%330 : memref<1x16xf32, #tpu.memory_space<vmem>>)
    %c11_i32_200 = arith.constant 11 : i32
    %c0_i32_201 = arith.constant 0 : i32
    %333 = tpu.memref_slice %arg3[%104, %c0_i32_201] : memref<100x16xf32, #tpu.memory_space<any>> -> memref<1x16xf32, #tpu.memory_space<any>>
    %c11_i32_202 = arith.constant 11 : i32
    %c0_i32_203 = arith.constant 0 : i32
    %334 = tpu.memref_slice %arg5[%c11_i32_202, %c0_i32_203] : memref<32x16xf32, #tpu.memory_space<vmem>> -> memref<1x16xf32, #tpu.memory_space<vmem>>
    %335 = tpu.memref_slice %arg6[%c11_i32_200] : memref<32x!tpu.dma_semaphore, #tpu.memory_space<semaphore_mem>> -> memref<1x!tpu.dma_semaphore, #tpu.memory_space<semaphore_mem>>
    %336 = tpu.memref_squeeze %335 : memref<1x!tpu.dma_semaphore, #tpu.memory_space<semaphore_mem>> -> memref<!tpu.dma_semaphore, #tpu.memory_space<semaphore_mem>>
    tpu.wait_dma2 semaphore(%336 : memref<!tpu.dma_semaphore, #tpu.memory_space<semaphore_mem>>) src(%333 : memref<1x16xf32, #tpu.memory_space<any>>) dst(%334 : memref<1x16xf32, #tpu.memory_space<vmem>>)
    %c12_i32_204 = arith.constant 12 : i32
    %c0_i32_205 = arith.constant 0 : i32
    %337 = tpu.memref_slice %arg3[%113, %c0_i32_205] : memref<100x16xf32, #tpu.memory_space<any>> -> memref<1x16xf32, #tpu.memory_space<any>>
    %c12_i32_206 = arith.constant 12 : i32
    %c0_i32_207 = arith.constant 0 : i32
    %338 = tpu.memref_slice %arg5[%c12_i32_206, %c0_i32_207] : memref<32x16xf32, #tpu.memory_space<vmem>> -> memref<1x16xf32, #tpu.memory_space<vmem>>
    %339 = tpu.memref_slice %arg6[%c12_i32_204] : memref<32x!tpu.dma_semaphore, #tpu.memory_space<semaphore_mem>> -> memref<1x!tpu.dma_semaphore, #tpu.memory_space<semaphore_mem>>
    %340 = tpu.memref_squeeze %339 : memref<1x!tpu.dma_semaphore, #tpu.memory_space<semaphore_mem>> -> memref<!tpu.dma_semaphore, #tpu.memory_space<semaphore_mem>>
    tpu.wait_dma2 semaphore(%340 : memref<!tpu.dma_semaphore, #tpu.memory_space<semaphore_mem>>) src(%337 : memref<1x16xf32, #tpu.memory_space<any>>) dst(%338 : memref<1x16xf32, #tpu.memory_space<vmem>>)
    %c13_i32_208 = arith.constant 13 : i32
    %c0_i32_209 = arith.constant 0 : i32
    %341 = tpu.memref_slice %arg3[%122, %c0_i32_209] : memref<100x16xf32, #tpu.memory_space<any>> -> memref<1x16xf32, #tpu.memory_space<any>>
    %c13_i32_210 = arith.constant 13 : i32
    %c0_i32_211 = arith.constant 0 : i32
    %342 = tpu.memref_slice %arg5[%c13_i32_210, %c0_i32_211] : memref<32x16xf32, #tpu.memory_space<vmem>> -> memref<1x16xf32, #tpu.memory_space<vmem>>
    %343 = tpu.memref_slice %arg6[%c13_i32_208] : memref<32x!tpu.dma_semaphore, #tpu.memory_space<semaphore_mem>> -> memref<1x!tpu.dma_semaphore, #tpu.memory_space<semaphore_mem>>
    %344 = tpu.memref_squeeze %343 : memref<1x!tpu.dma_semaphore, #tpu.memory_space<semaphore_mem>> -> memref<!tpu.dma_semaphore, #tpu.memory_space<semaphore_mem>>
    tpu.wait_dma2 semaphore(%344 : memref<!tpu.dma_semaphore, #tpu.memory_space<semaphore_mem>>) src(%341 : memref<1x16xf32, #tpu.memory_space<any>>) dst(%342 : memref<1x16xf32, #tpu.memory_space<vmem>>)
    %c14_i32_212 = arith.constant 14 : i32
    %c0_i32_213 = arith.constant 0 : i32
    %345 = tpu.memref_slice %arg3[%131, %c0_i32_213] : memref<100x16xf32, #tpu.memory_space<any>> -> memref<1x16xf32, #tpu.memory_space<any>>
    %c14_i32_214 = arith.constant 14 : i32
    %c0_i32_215 = arith.constant 0 : i32
    %346 = tpu.memref_slice %arg5[%c14_i32_214, %c0_i32_215] : memref<32x16xf32, #tpu.memory_space<vmem>> -> memref<1x16xf32, #tpu.memory_space<vmem>>
    %347 = tpu.memref_slice %arg6[%c14_i32_212] : memref<32x!tpu.dma_semaphore, #tpu.memory_space<semaphore_mem>> -> memref<1x!tpu.dma_semaphore, #tpu.memory_space<semaphore_mem>>
    %348 = tpu.memref_squeeze %347 : memref<1x!tpu.dma_semaphore, #tpu.memory_space<semaphore_mem>> -> memref<!tpu.dma_semaphore, #tpu.memory_space<semaphore_mem>>
    tpu.wait_dma2 semaphore(%348 : memref<!tpu.dma_semaphore, #tpu.memory_space<semaphore_mem>>) src(%345 : memref<1x16xf32, #tpu.memory_space<any>>) dst(%346 : memref<1x16xf32, #tpu.memory_space<vmem>>)
    %c15_i32_216 = arith.constant 15 : i32
    %c0_i32_217 = arith.constant 0 : i32
    %349 = tpu.memref_slice %arg3[%140, %c0_i32_217] : memref<100x16xf32, #tpu.memory_space<any>> -> memref<1x16xf32, #tpu.memory_space<any>>
    %c15_i32_218 = arith.constant 15 : i32
    %c0_i32_219 = arith.constant 0 : i32
    %350 = tpu.memref_slice %arg5[%c15_i32_218, %c0_i32_219] : memref<32x16xf32, #tpu.memory_space<vmem>> -> memref<1x16xf32, #tpu.memory_space<vmem>>
    %351 = tpu.memref_slice %arg6[%c15_i32_216] : memref<32x!tpu.dma_semaphore, #tpu.memory_space<semaphore_mem>> -> memref<1x!tpu.dma_semaphore, #tpu.memory_space<semaphore_mem>>
    %352 = tpu.memref_squeeze %351 : memref<1x!tpu.dma_semaphore, #tpu.memory_space<semaphore_mem>> -> memref<!tpu.dma_semaphore, #tpu.memory_space<semaphore_mem>>
    tpu.wait_dma2 semaphore(%352 : memref<!tpu.dma_semaphore, #tpu.memory_space<semaphore_mem>>) src(%349 : memref<1x16xf32, #tpu.memory_space<any>>) dst(%350 : memref<1x16xf32, #tpu.memory_space<vmem>>)
    %c16_i32_220 = arith.constant 16 : i32
    %c0_i32_221 = arith.constant 0 : i32
    %353 = tpu.memref_slice %arg3[%149, %c0_i32_221] : memref<100x16xf32, #tpu.memory_space<any>> -> memref<1x16xf32, #tpu.memory_space<any>>
    %c16_i32_222 = arith.constant 16 : i32
    %c0_i32_223 = arith.constant 0 : i32
    %354 = tpu.memref_slice %arg5[%c16_i32_222, %c0_i32_223] : memref<32x16xf32, #tpu.memory_space<vmem>> -> memref<1x16xf32, #tpu.memory_space<vmem>>
    %355 = tpu.memref_slice %arg6[%c16_i32_220] : memref<32x!tpu.dma_semaphore, #tpu.memory_space<semaphore_mem>> -> memref<1x!tpu.dma_semaphore, #tpu.memory_space<semaphore_mem>>
    %356 = tpu.memref_squeeze %355 : memref<1x!tpu.dma_semaphore, #tpu.memory_space<semaphore_mem>> -> memref<!tpu.dma_semaphore, #tpu.memory_space<semaphore_mem>>
    tpu.wait_dma2 semaphore(%356 : memref<!tpu.dma_semaphore, #tpu.memory_space<semaphore_mem>>) src(%353 : memref<1x16xf32, #tpu.memory_space<any>>) dst(%354 : memref<1x16xf32, #tpu.memory_space<vmem>>)
    %c17_i32_224 = arith.constant 17 : i32
    %c0_i32_225 = arith.constant 0 : i32
    %357 = tpu.memref_slice %arg3[%158, %c0_i32_225] : memref<100x16xf32, #tpu.memory_space<any>> -> memref<1x16xf32, #tpu.memory_space<any>>
    %c17_i32_226 = arith.constant 17 : i32
    %c0_i32_227 = arith.constant 0 : i32
    %358 = tpu.memref_slice %arg5[%c17_i32_226, %c0_i32_227] : memref<32x16xf32, #tpu.memory_space<vmem>> -> memref<1x16xf32, #tpu.memory_space<vmem>>
    %359 = tpu.memref_slice %arg6[%c17_i32_224] : memref<32x!tpu.dma_semaphore, #tpu.memory_space<semaphore_mem>> -> memref<1x!tpu.dma_semaphore, #tpu.memory_space<semaphore_mem>>
    %360 = tpu.memref_squeeze %359 : memref<1x!tpu.dma_semaphore, #tpu.memory_space<semaphore_mem>> -> memref<!tpu.dma_semaphore, #tpu.memory_space<semaphore_mem>>
    tpu.wait_dma2 semaphore(%360 : memref<!tpu.dma_semaphore, #tpu.memory_space<semaphore_mem>>) src(%357 : memref<1x16xf32, #tpu.memory_space<any>>) dst(%358 : memref<1x16xf32, #tpu.memory_space<vmem>>)
    %c18_i32_228 = arith.constant 18 : i32
    %c0_i32_229 = arith.constant 0 : i32
    %361 = tpu.memref_slice %arg3[%167, %c0_i32_229] : memref<100x16xf32, #tpu.memory_space<any>> -> memref<1x16xf32, #tpu.memory_space<any>>
    %c18_i32_230 = arith.constant 18 : i32
    %c0_i32_231 = arith.constant 0 : i32
    %362 = tpu.memref_slice %arg5[%c18_i32_230, %c0_i32_231] : memref<32x16xf32, #tpu.memory_space<vmem>> -> memref<1x16xf32, #tpu.memory_space<vmem>>
    %363 = tpu.memref_slice %arg6[%c18_i32_228] : memref<32x!tpu.dma_semaphore, #tpu.memory_space<semaphore_mem>> -> memref<1x!tpu.dma_semaphore, #tpu.memory_space<semaphore_mem>>
    %364 = tpu.memref_squeeze %363 : memref<1x!tpu.dma_semaphore, #tpu.memory_space<semaphore_mem>> -> memref<!tpu.dma_semaphore, #tpu.memory_space<semaphore_mem>>
    tpu.wait_dma2 semaphore(%364 : memref<!tpu.dma_semaphore, #tpu.memory_space<semaphore_mem>>) src(%361 : memref<1x16xf32, #tpu.memory_space<any>>) dst(%362 : memref<1x16xf32, #tpu.memory_space<vmem>>)
    %c19_i32_232 = arith.constant 19 : i32
    %c0_i32_233 = arith.constant 0 : i32
    %365 = tpu.memref_slice %arg3[%176, %c0_i32_233] : memref<100x16xf32, #tpu.memory_space<any>> -> memref<1x16xf32, #tpu.memory_space<any>>
    %c19_i32_234 = arith.constant 19 : i32
    %c0_i32_235 = arith.constant 0 : i32
    %366 = tpu.memref_slice %arg5[%c19_i32_234, %c0_i32_235] : memref<32x16xf32, #tpu.memory_space<vmem>> -> memref<1x16xf32, #tpu.memory_space<vmem>>
    %367 = tpu.memref_slice %arg6[%c19_i32_232] : memref<32x!tpu.dma_semaphore, #tpu.memory_space<semaphore_mem>> -> memref<1x!tpu.dma_semaphore, #tpu.memory_space<semaphore_mem>>
    %368 = tpu.memref_squeeze %367 : memref<1x!tpu.dma_semaphore, #tpu.memory_space<semaphore_mem>> -> memref<!tpu.dma_semaphore, #tpu.memory_space<semaphore_mem>>
    tpu.wait_dma2 semaphore(%368 : memref<!tpu.dma_semaphore, #tpu.memory_space<semaphore_mem>>) src(%365 : memref<1x16xf32, #tpu.memory_space<any>>) dst(%366 : memref<1x16xf32, #tpu.memory_space<vmem>>)
    %c20_i32_236 = arith.constant 20 : i32
    %c0_i32_237 = arith.constant 0 : i32
    %369 = tpu.memref_slice %arg3[%185, %c0_i32_237] : memref<100x16xf32, #tpu.memory_space<any>> -> memref<1x16xf32, #tpu.memory_space<any>>
    %c20_i32_238 = arith.constant 20 : i32
    %c0_i32_239 = arith.constant 0 : i32
    %370 = tpu.memref_slice %arg5[%c20_i32_238, %c0_i32_239] : memref<32x16xf32, #tpu.memory_space<vmem>> -> memref<1x16xf32, #tpu.memory_space<vmem>>
    %371 = tpu.memref_slice %arg6[%c20_i32_236] : memref<32x!tpu.dma_semaphore, #tpu.memory_space<semaphore_mem>> -> memref<1x!tpu.dma_semaphore, #tpu.memory_space<semaphore_mem>>
    %372 = tpu.memref_squeeze %371 : memref<1x!tpu.dma_semaphore, #tpu.memory_space<semaphore_mem>> -> memref<!tpu.dma_semaphore, #tpu.memory_space<semaphore_mem>>
    tpu.wait_dma2 semaphore(%372 : memref<!tpu.dma_semaphore, #tpu.memory_space<semaphore_mem>>) src(%369 : memref<1x16xf32, #tpu.memory_space<any>>) dst(%370 : memref<1x16xf32, #tpu.memory_space<vmem>>)
    %c21_i32_240 = arith.constant 21 : i32
    %c0_i32_241 = arith.constant 0 : i32
    %373 = tpu.memref_slice %arg3[%194, %c0_i32_241] : memref<100x16xf32, #tpu.memory_space<any>> -> memref<1x16xf32, #tpu.memory_space<any>>
    %c21_i32_242 = arith.constant 21 : i32
    %c0_i32_243 = arith.constant 0 : i32
    %374 = tpu.memref_slice %arg5[%c21_i32_242, %c0_i32_243] : memref<32x16xf32, #tpu.memory_space<vmem>> -> memref<1x16xf32, #tpu.memory_space<vmem>>
    %375 = tpu.memref_slice %arg6[%c21_i32_240] : memref<32x!tpu.dma_semaphore, #tpu.memory_space<semaphore_mem>> -> memref<1x!tpu.dma_semaphore, #tpu.memory_space<semaphore_mem>>
    %376 = tpu.memref_squeeze %375 : memref<1x!tpu.dma_semaphore, #tpu.memory_space<semaphore_mem>> -> memref<!tpu.dma_semaphore, #tpu.memory_space<semaphore_mem>>
    tpu.wait_dma2 semaphore(%376 : memref<!tpu.dma_semaphore, #tpu.memory_space<semaphore_mem>>) src(%373 : memref<1x16xf32, #tpu.memory_space<any>>) dst(%374 : memref<1x16xf32, #tpu.memory_space<vmem>>)
    %c22_i32_244 = arith.constant 22 : i32
    %c0_i32_245 = arith.constant 0 : i32
    %377 = tpu.memref_slice %arg3[%203, %c0_i32_245] : memref<100x16xf32, #tpu.memory_space<any>> -> memref<1x16xf32, #tpu.memory_space<any>>
    %c22_i32_246 = arith.constant 22 : i32
    %c0_i32_247 = arith.constant 0 : i32
    %378 = tpu.memref_slice %arg5[%c22_i32_246, %c0_i32_247] : memref<32x16xf32, #tpu.memory_space<vmem>> -> memref<1x16xf32, #tpu.memory_space<vmem>>
    %379 = tpu.memref_slice %arg6[%c22_i32_244] : memref<32x!tpu.dma_semaphore, #tpu.memory_space<semaphore_mem>> -> memref<1x!tpu.dma_semaphore, #tpu.memory_space<semaphore_mem>>
    %380 = tpu.memref_squeeze %379 : memref<1x!tpu.dma_semaphore, #tpu.memory_space<semaphore_mem>> -> memref<!tpu.dma_semaphore, #tpu.memory_space<semaphore_mem>>
    tpu.wait_dma2 semaphore(%380 : memref<!tpu.dma_semaphore, #tpu.memory_space<semaphore_mem>>) src(%377 : memref<1x16xf32, #tpu.memory_space<any>>) dst(%378 : memref<1x16xf32, #tpu.memory_space<vmem>>)
    %c23_i32_248 = arith.constant 23 : i32
    %c0_i32_249 = arith.constant 0 : i32
    %381 = tpu.memref_slice %arg3[%212, %c0_i32_249] : memref<100x16xf32, #tpu.memory_space<any>> -> memref<1x16xf32, #tpu.memory_space<any>>
    %c23_i32_250 = arith.constant 23 : i32
    %c0_i32_251 = arith.constant 0 : i32
    %382 = tpu.memref_slice %arg5[%c23_i32_250, %c0_i32_251] : memref<32x16xf32, #tpu.memory_space<vmem>> -> memref<1x16xf32, #tpu.memory_space<vmem>>
    %383 = tpu.memref_slice %arg6[%c23_i32_248] : memref<32x!tpu.dma_semaphore, #tpu.memory_space<semaphore_mem>> -> memref<1x!tpu.dma_semaphore, #tpu.memory_space<semaphore_mem>>
    %384 = tpu.memref_squeeze %383 : memref<1x!tpu.dma_semaphore, #tpu.memory_space<semaphore_mem>> -> memref<!tpu.dma_semaphore, #tpu.memory_space<semaphore_mem>>
    tpu.wait_dma2 semaphore(%384 : memref<!tpu.dma_semaphore, #tpu.memory_space<semaphore_mem>>) src(%381 : memref<1x16xf32, #tpu.memory_space<any>>) dst(%382 : memref<1x16xf32, #tpu.memory_space<vmem>>)
    %c24_i32_252 = arith.constant 24 : i32
    %c0_i32_253 = arith.constant 0 : i32
    %385 = tpu.memref_slice %arg3[%221, %c0_i32_253] : memref<100x16xf32, #tpu.memory_space<any>> -> memref<1x16xf32, #tpu.memory_space<any>>
    %c24_i32_254 = arith.constant 24 : i32
    %c0_i32_255 = arith.constant 0 : i32
    %386 = tpu.memref_slice %arg5[%c24_i32_254, %c0_i32_255] : memref<32x16xf32, #tpu.memory_space<vmem>> -> memref<1x16xf32, #tpu.memory_space<vmem>>
    %387 = tpu.memref_slice %arg6[%c24_i32_252] : memref<32x!tpu.dma_semaphore, #tpu.memory_space<semaphore_mem>> -> memref<1x!tpu.dma_semaphore, #tpu.memory_space<semaphore_mem>>
    %388 = tpu.memref_squeeze %387 : memref<1x!tpu.dma_semaphore, #tpu.memory_space<semaphore_mem>> -> memref<!tpu.dma_semaphore, #tpu.memory_space<semaphore_mem>>
    tpu.wait_dma2 semaphore(%388 : memref<!tpu.dma_semaphore, #tpu.memory_space<semaphore_mem>>) src(%385 : memref<1x16xf32, #tpu.memory_space<any>>) dst(%386 : memref<1x16xf32, #tpu.memory_space<vmem>>)
    %c25_i32_256 = arith.constant 25 : i32
    %c0_i32_257 = arith.constant 0 : i32
    %389 = tpu.memref_slice %arg3[%230, %c0_i32_257] : memref<100x16xf32, #tpu.memory_space<any>> -> memref<1x16xf32, #tpu.memory_space<any>>
    %c25_i32_258 = arith.constant 25 : i32
    %c0_i32_259 = arith.constant 0 : i32
    %390 = tpu.memref_slice %arg5[%c25_i32_258, %c0_i32_259] : memref<32x16xf32, #tpu.memory_space<vmem>> -> memref<1x16xf32, #tpu.memory_space<vmem>>
    %391 = tpu.memref_slice %arg6[%c25_i32_256] : memref<32x!tpu.dma_semaphore, #tpu.memory_space<semaphore_mem>> -> memref<1x!tpu.dma_semaphore, #tpu.memory_space<semaphore_mem>>
    %392 = tpu.memref_squeeze %391 : memref<1x!tpu.dma_semaphore, #tpu.memory_space<semaphore_mem>> -> memref<!tpu.dma_semaphore, #tpu.memory_space<semaphore_mem>>
    tpu.wait_dma2 semaphore(%392 : memref<!tpu.dma_semaphore, #tpu.memory_space<semaphore_mem>>) src(%389 : memref<1x16xf32, #tpu.memory_space<any>>) dst(%390 : memref<1x16xf32, #tpu.memory_space<vmem>>)
    %c26_i32_260 = arith.constant 26 : i32
    %c0_i32_261 = arith.constant 0 : i32
    %393 = tpu.memref_slice %arg3[%239, %c0_i32_261] : memref<100x16xf32, #tpu.memory_space<any>> -> memref<1x16xf32, #tpu.memory_space<any>>
    %c26_i32_262 = arith.constant 26 : i32
    %c0_i32_263 = arith.constant 0 : i32
    %394 = tpu.memref_slice %arg5[%c26_i32_262, %c0_i32_263] : memref<32x16xf32, #tpu.memory_space<vmem>> -> memref<1x16xf32, #tpu.memory_space<vmem>>
    %395 = tpu.memref_slice %arg6[%c26_i32_260] : memref<32x!tpu.dma_semaphore, #tpu.memory_space<semaphore_mem>> -> memref<1x!tpu.dma_semaphore, #tpu.memory_space<semaphore_mem>>
    %396 = tpu.memref_squeeze %395 : memref<1x!tpu.dma_semaphore, #tpu.memory_space<semaphore_mem>> -> memref<!tpu.dma_semaphore, #tpu.memory_space<semaphore_mem>>
    tpu.wait_dma2 semaphore(%396 : memref<!tpu.dma_semaphore, #tpu.memory_space<semaphore_mem>>) src(%393 : memref<1x16xf32, #tpu.memory_space<any>>) dst(%394 : memref<1x16xf32, #tpu.memory_space<vmem>>)
    %c27_i32_264 = arith.constant 27 : i32
    %c0_i32_265 = arith.constant 0 : i32
    %397 = tpu.memref_slice %arg3[%248, %c0_i32_265] : memref<100x16xf32, #tpu.memory_space<any>> -> memref<1x16xf32, #tpu.memory_space<any>>
    %c27_i32_266 = arith.constant 27 : i32
    %c0_i32_267 = arith.constant 0 : i32
    %398 = tpu.memref_slice %arg5[%c27_i32_266, %c0_i32_267] : memref<32x16xf32, #tpu.memory_space<vmem>> -> memref<1x16xf32, #tpu.memory_space<vmem>>
    %399 = tpu.memref_slice %arg6[%c27_i32_264] : memref<32x!tpu.dma_semaphore, #tpu.memory_space<semaphore_mem>> -> memref<1x!tpu.dma_semaphore, #tpu.memory_space<semaphore_mem>>
    %400 = tpu.memref_squeeze %399 : memref<1x!tpu.dma_semaphore, #tpu.memory_space<semaphore_mem>> -> memref<!tpu.dma_semaphore, #tpu.memory_space<semaphore_mem>>
    tpu.wait_dma2 semaphore(%400 : memref<!tpu.dma_semaphore, #tpu.memory_space<semaphore_mem>>) src(%397 : memref<1x16xf32, #tpu.memory_space<any>>) dst(%398 : memref<1x16xf32, #tpu.memory_space<vmem>>)
    %c28_i32_268 = arith.constant 28 : i32
    %c0_i32_269 = arith.constant 0 : i32
    %401 = tpu.memref_slice %arg3[%257, %c0_i32_269] : memref<100x16xf32, #tpu.memory_space<any>> -> memref<1x16xf32, #tpu.memory_space<any>>
    %c28_i32_270 = arith.constant 28 : i32
    %c0_i32_271 = arith.constant 0 : i32
    %402 = tpu.memref_slice %arg5[%c28_i32_270, %c0_i32_271] : memref<32x16xf32, #tpu.memory_space<vmem>> -> memref<1x16xf32, #tpu.memory_space<vmem>>
    %403 = tpu.memref_slice %arg6[%c28_i32_268] : memref<32x!tpu.dma_semaphore, #tpu.memory_space<semaphore_mem>> -> memref<1x!tpu.dma_semaphore, #tpu.memory_space<semaphore_mem>>
    %404 = tpu.memref_squeeze %403 : memref<1x!tpu.dma_semaphore, #tpu.memory_space<semaphore_mem>> -> memref<!tpu.dma_semaphore, #tpu.memory_space<semaphore_mem>>
    tpu.wait_dma2 semaphore(%404 : memref<!tpu.dma_semaphore, #tpu.memory_space<semaphore_mem>>) src(%401 : memref<1x16xf32, #tpu.memory_space<any>>) dst(%402 : memref<1x16xf32, #tpu.memory_space<vmem>>)
    %c29_i32_272 = arith.constant 29 : i32
    %c0_i32_273 = arith.constant 0 : i32
    %405 = tpu.memref_slice %arg3[%266, %c0_i32_273] : memref<100x16xf32, #tpu.memory_space<any>> -> memref<1x16xf32, #tpu.memory_space<any>>
    %c29_i32_274 = arith.constant 29 : i32
    %c0_i32_275 = arith.constant 0 : i32
    %406 = tpu.memref_slice %arg5[%c29_i32_274, %c0_i32_275] : memref<32x16xf32, #tpu.memory_space<vmem>> -> memref<1x16xf32, #tpu.memory_space<vmem>>
    %407 = tpu.memref_slice %arg6[%c29_i32_272] : memref<32x!tpu.dma_semaphore, #tpu.memory_space<semaphore_mem>> -> memref<1x!tpu.dma_semaphore, #tpu.memory_space<semaphore_mem>>
    %408 = tpu.memref_squeeze %407 : memref<1x!tpu.dma_semaphore, #tpu.memory_space<semaphore_mem>> -> memref<!tpu.dma_semaphore, #tpu.memory_space<semaphore_mem>>
    tpu.wait_dma2 semaphore(%408 : memref<!tpu.dma_semaphore, #tpu.memory_space<semaphore_mem>>) src(%405 : memref<1x16xf32, #tpu.memory_space<any>>) dst(%406 : memref<1x16xf32, #tpu.memory_space<vmem>>)
    %c30_i32_276 = arith.constant 30 : i32
    %c0_i32_277 = arith.constant 0 : i32
    %409 = tpu.memref_slice %arg3[%275, %c0_i32_277] : memref<100x16xf32, #tpu.memory_space<any>> -> memref<1x16xf32, #tpu.memory_space<any>>
    %c30_i32_278 = arith.constant 30 : i32
    %c0_i32_279 = arith.constant 0 : i32
    %410 = tpu.memref_slice %arg5[%c30_i32_278, %c0_i32_279] : memref<32x16xf32, #tpu.memory_space<vmem>> -> memref<1x16xf32, #tpu.memory_space<vmem>>
    %411 = tpu.memref_slice %arg6[%c30_i32_276] : memref<32x!tpu.dma_semaphore, #tpu.memory_space<semaphore_mem>> -> memref<1x!tpu.dma_semaphore, #tpu.memory_space<semaphore_mem>>
    %412 = tpu.memref_squeeze %411 : memref<1x!tpu.dma_semaphore, #tpu.memory_space<semaphore_mem>> -> memref<!tpu.dma_semaphore, #tpu.memory_space<semaphore_mem>>
    tpu.wait_dma2 semaphore(%412 : memref<!tpu.dma_semaphore, #tpu.memory_space<semaphore_mem>>) src(%409 : memref<1x16xf32, #tpu.memory_space<any>>) dst(%410 : memref<1x16xf32, #tpu.memory_space<vmem>>)
    %c31_i32_280 = arith.constant 31 : i32
    %c0_i32_281 = arith.constant 0 : i32
    %413 = tpu.memref_slice %arg3[%284, %c0_i32_281] : memref<100x16xf32, #tpu.memory_space<any>> -> memref<1x16xf32, #tpu.memory_space<any>>
    %c31_i32_282 = arith.constant 31 : i32
    %c0_i32_283 = arith.constant 0 : i32
    %414 = tpu.memref_slice %arg5[%c31_i32_282, %c0_i32_283] : memref<32x16xf32, #tpu.memory_space<vmem>> -> memref<1x16xf32, #tpu.memory_space<vmem>>
    %415 = tpu.memref_slice %arg6[%c31_i32_280] : memref<32x!tpu.dma_semaphore, #tpu.memory_space<semaphore_mem>> -> memref<1x!tpu.dma_semaphore, #tpu.memory_space<semaphore_mem>>
    %416 = tpu.memref_squeeze %415 : memref<1x!tpu.dma_semaphore, #tpu.memory_space<semaphore_mem>> -> memref<!tpu.dma_semaphore, #tpu.memory_space<semaphore_mem>>
    tpu.wait_dma2 semaphore(%416 : memref<!tpu.dma_semaphore, #tpu.memory_space<semaphore_mem>>) src(%413 : memref<1x16xf32, #tpu.memory_space<any>>) dst(%414 : memref<1x16xf32, #tpu.memory_space<vmem>>)
    %c0_284 = arith.constant 0 : index
    %c0_285 = arith.constant 0 : index
    %417 = vector.load %arg5[%c0_284, %c0_285] : memref<32x16xf32, #tpu.memory_space<vmem>>, vector<32x16xf32>
    %c0_286 = arith.constant 0 : index
    %c0_287 = arith.constant 0 : index
    %418 = vector.load %arg4[%c0_286, %c0_287] : memref<32x16xf32, #tpu.memory_space<vmem>>, vector<32x16xf32>
    tpu.vector_store %arg4[%c0_286, %c0_287], %417 {strides = array<i32>} : memref<32x16xf32, #tpu.memory_space<vmem>>, vector<32x16xf32>,
    return
  }
  func.func @transform_1(%arg0: i32, %arg1: memref<32xi32, #tpu.memory_space<smem>>, %arg2: memref<4xi32, #tpu.memory_space<smem>>) -> (i32, i32) {
    %c0_i32 = arith.constant 0 : i32
    %c0_i32_0 = arith.constant 0 : i32
    return %arg0, %c0_i32 : i32, i32
  }
}

</mosaic_0001>

<bundles_post_ra>
// kernel: features_embedding_forward.1
= control target key start
LH: loop header
LB: loop body
LE: loop exit
PB: predicated region body
PF: predicated region fallthrough
CT: control target
= control target key end

     0   :  { %s2722_s0 = inlined_call_operand.vmem [shape: s32[32], index: 0, kind: input, shape index: {}]   ;;  %s2723_s2 = inlined_call_operand.vmem [shape: f32[100,16], index: 2, kind: input, shape index: {}]   ;;  %s2724_s3 = inlined_call_operand.hbm [shape: f32[32,16], index: 3, kind: output, shape index: {}]   ;;  %s2725_s1 = inlined_call_operand.vmem [shape: s32[4], index: 1, kind: input, shape index: {}]  }
   0x1   :  { %s8_s14 = sshll.u32 %s2722_s0, 4  ;;  %s12_s17 = sshll.u32 %s2725_s1, 4  ;;  %s9_s14 = int_to_ptr.vmem [resolvable:$true] %s8_s14  ;;  %s13_s17 = int_to_ptr.vmem [resolvable:$true] %s12_s17 }
   0x2   :  { %s2469_s18 = scalar_lea.vmem %s9_s14, 16  ;;  %p2474_p1 = scmp.lt.s32.totalorder %s9_s14, %s9_s14 }
   0x3   :  { %p2470_p0 = scmp.ne.s32.totalorder %s9_s14, %s2469_s18  ;;  %p2475_p2 = scmp.lt.s32.totalorder %s2469_s18, %s2469_s18 }
   0x5   :  { %p2476_p3 = por %p2475_p2, %p2474_p1 }
   0x7   :  { %p2477_p4 = pnand %p2476_p3, %p2470_p0 }
   0x9   :  { %2480 = shalt.err (!%p2477_p4)  }
   0xa   :  { %s2583_s19 = smov [#allocation5]   ;;  %s2481_s20 = scalar_lea.vmem %s13_s17, 16 }
   0xb   :  { %11 = dma.vmem_to_smem %s9_s14, 16, %s2583_s19, [#allocation4] }
   0xc   :  { %p2482_p5 = scmp.ne.s32.totalorder %s13_s17, %s2481_s20  ;;  %p2486_p6 = scmp.lt.s32.totalorder %s13_s17, %s13_s17 }
   0xd   :  { %p2487_p7 = scmp.lt.s32.totalorder %s2481_s20, %s2481_s20 }
   0xf   :  { %p2488_p8 = por %p2487_p7, %p2486_p6 }
  0x11   :  { %p2489_p9 = pnand %p2488_p8, %p2482_p5 }
  0x13   :  { %2492 = shalt.err (!%p2489_p9)  }
  0x14   :  { %s2584_s0 = smov [#allocation6]  }
  0x15   :  { %15 = dma.vmem_to_smem %s13_s17, 16, %s2584_s0, [#allocation4] }
  0x16   :  { %2515 = dma.done.wait [#allocation4], 32 }
  0x17   :  { %2516 = vsyncadd [#allocation4], 4294967264 }
  0x18   :  { %17 = sfence }
  0x19   :  { %18 = vsyncpa [#allocation8], 0  ;;  %s20_s1 = sld [smem:[#allocation5]] }
  0x1a   :  { %s21_s21 = sld [smem:[#allocation6]] }
  0x20   :  { %s22_s22 = sadd.s32 %s21_s21, %s20_s1 }
  0x21   :  { %s23_s25 = scalar_lea.vmem %s2723_s2, %s22_s22 }
  0x22   :  { %v41_v0 = vld [vmem:[%s23_s25] sm:$0x1] }
  0x23   :  { %42 = vst [vmem:[#allocation2] sm:$0x1] %v41_v0 }
  0x24   :  { %67 = vsyncadd [#allocation3], 16  ;;  %s2377_s26 = sld [smem:[#allocation5 + $0x1]] }
  0x25   :  { %s2378_s27 = sld [smem:[#allocation6 + $0x1]] }
  0x2b   :  { %s71_s28 = sadd.s32 %s2378_s27, %s2377_s26 }
  0x2c   :  { %s72_s4 = scalar_lea.vmem %s2723_s2, %s71_s28 }
  0x2d   :  { %v92_v1 = vld [vmem:[%s72_s4] sm:$0x1] }
  0x2e   :  { %93 = vst [vmem:[#allocation2 + $0x1] sm:$0x1] %v92_v1 }
  0x2f   :  { %118 = vsyncadd [#allocation3 + $0x1], 16  ;;  %s2379_s5 = sld [smem:[#allocation5 + $0x2]] }
  0x30   :  { %s2380_s6 = sld [smem:[#allocation6 + $0x2]] }
  0x36   :  { %s122_s7 = sadd.s32 %s2380_s6, %s2379_s5 }
  0x37   :  { %s123_s10 = scalar_lea.vmem %s2723_s2, %s122_s7 }
  0x38   :  { %v143_v2 = vld [vmem:[%s123_s10] sm:$0x1] }
  0x39   :  { %144 = vst [vmem:[#allocation2 + $0x2] sm:$0x1] %v143_v2 }
  0x3a   :  { %169 = vsyncadd [#allocation3 + $0x2], 16  ;;  %s2381_s11 = sld [smem:[#allocation5 + $0x3]] }
  0x3b   :  { %s2382_s12 = sld [smem:[#allocation6 + $0x3]] }
  0x41   :  { %s173_s13 = sadd.s32 %s2382_s12, %s2381_s11 }
  0x42   :  { %s174_s16 = scalar_lea.vmem %s2723_s2, %s173_s13 }
  0x43   :  { %v194_v3 = vld [vmem:[%s174_s16] sm:$0x1] }
  0x44   :  { %195 = vst [vmem:[#allocation2 + $0x3] sm:$0x1] %v194_v3 }
  0x45   :  { %220 = vsyncadd [#allocation3 + $0x3], 16  ;;  %s2383_s17 = sld [smem:[#allocation5 + $0x4]]  ;;  %s223_s18 = sld [smem:[#allocation6]] }
  0x4b   :  { %s224_s19 = sadd.s32 %s2383_s17, %s223_s18 }
  0x4c   :  { %s225_s1 = scalar_lea.vmem %s2723_s2, %s224_s19 }
  0x4d   :  { %v245_v4 = vld [vmem:[%s225_s1] sm:$0x1] }
  0x4e   :  { %246 = vst [vmem:[#allocation2 + $0x4] sm:$0x1] %v245_v4 }
  0x4f   :  { %271 = vsyncadd [#allocation3 + $0x4], 16  ;;  %s2384_s21 = sld [smem:[#allocation5 + $0x5]]  ;;  %s2385_s22 = sld [smem:[#allocation6 + $0x1]] }
  0x55   :  { %s275_s23 = sadd.s32 %s2385_s22, %s2384_s21 }
  0x56   :  { %s276_s26 = scalar_lea.vmem %s2723_s2, %s275_s23 }
  0x57   :  { %v296_v5 = vld [vmem:[%s276_s26] sm:$0x1] }
  0x58   :  { %297 = vst [vmem:[#allocation2 + $0x5] sm:$0x1] %v296_v5 }
  0x59   :  { %322 = vsyncadd [#allocation3 + $0x5], 16  ;;  %s2386_s27 = sld [smem:[#allocation5 + $0x6]]  ;;  %s2387_s28 = sld [smem:[#allocation6 + $0x2]] }
  0x5f   :  { %s326_s29 = sadd.s32 %s2387_s28, %s2386_s27 }
  0x60   :  { %s327_s5 = scalar_lea.vmem %s2723_s2, %s326_s29 }
  0x61   :  { %v347_v6 = vld [vmem:[%s327_s5] sm:$0x1] }
  0x62   :  { %348 = vst [vmem:[#allocation2 + $0x6] sm:$0x1] %v347_v6 }
  0x63   :  { %373 = vsyncadd [#allocation3 + $0x6], 16  ;;  %s2388_s6 = sld [smem:[#allocation5 + $0x7]]  ;;  %s2389_s7 = sld [smem:[#allocation6 + $0x3]] }
  0x69   :  { %s377_s8 = sadd.s32 %s2389_s7, %s2388_s6 }
  0x6a   :  { %s378_s11 = scalar_lea.vmem %s2723_s2, %s377_s8 }
  0x6b   :  { %v398_v7 = vld [vmem:[%s378_s11] sm:$0x1] }
  0x6c   :  { %399 = vst [vmem:[#allocation2 + $0x7] sm:$0x1] %v398_v7 }
  0x6d   :  { %424 = vsyncadd [#allocation3 + $0x7], 16  ;;  %s2390_s12 = sld [smem:[#allocation5 + $0x8]] }
  0x6e   :  { %s427_s13 = sld [smem:[#allocation6]] }
  0x74   :  { %s428_s14 = sadd.s32 %s2390_s12, %s427_s13 }
  0x75   :  { %s429_s17 = scalar_lea.vmem %s2723_s2, %s428_s14 }
  0x76   :  { %v449_v8 = vld [vmem:[%s429_s17] sm:$0x1] }
  0x77   :  { %450 = vst [vmem:[#allocation2 + $0x8] sm:$0x1] %v449_v8 }
  0x78   :  { %475 = vsyncadd [#allocation3 + $0x8], 16  ;;  %s2391_s18 = sld [smem:[#allocation5 + $0x9]] }
  0x79   :  { %s2392_s19 = sld [smem:[#allocation6 + $0x1]] }
  0x7f   :  { %s479_s20 = sadd.s32 %s2392_s19, %s2391_s18 }
  0x80   :  { %s480_s21 = scalar_lea.vmem %s2723_s2, %s479_s20 }
  0x81   :  { %v500_v9 = vld [vmem:[%s480_s21] sm:$0x1] }
  0x82   :  { %501 = vst [vmem:[#allocation2 + $0x9] sm:$0x1] %v500_v9 }
  0x83   :  { %526 = vsyncadd [#allocation3 + $0x9], 16  ;;  %s2393_s22 = sld [smem:[#allocation5 + $0xa]] }
  0x84   :  { %s2394_s23 = sld [smem:[#allocation6 + $0x2]] }
  0x8a   :  { %s530_s24 = sadd.s32 %s2394_s23, %s2393_s22 }
  0x8b   :  { %s531_s27 = scalar_lea.vmem %s2723_s2, %s530_s24 }
  0x8c   :  { %v551_v10 = vld [vmem:[%s531_s27] sm:$0x1] }
  0x8d   :  { %552 = vst [vmem:[#allocation2 + $0xa] sm:$0x1] %v551_v10 }
  0x8e   :  { %577 = vsyncadd [#allocation3 + $0xa], 16  ;;  %s2395_s28 = sld [smem:[#allocation5 + $0xb]] }
  0x8f   :  { %s2396_s29 = sld [smem:[#allocation6 + $0x3]] }
  0x95   :  { %s581_s30 = sadd.s32 %s2396_s29, %s2395_s28 }
  0x96   :  { %s582_s6 = scalar_lea.vmem %s2723_s2, %s581_s30 }
  0x97   :  { %v602_v11 = vld [vmem:[%s582_s6] sm:$0x1] }
  0x98   :  { %603 = vst [vmem:[#allocation2 + $0xb] sm:$0x1] %v602_v11 }
  0x99   :  { %628 = vsyncadd [#allocation3 + $0xb], 16  ;;  %s2397_s7 = sld [smem:[#allocation5 + $0xc]]  ;;  %s631_s8 = sld [smem:[#allocation6]] }
  0x9f   :  { %s632_s9 = sadd.s32 %s2397_s7, %s631_s8 }
  0xa0   :  { %s633_s12 = scalar_lea.vmem %s2723_s2, %s632_s9 }
  0xa1   :  { %v653_v12 = vld [vmem:[%s633_s12] sm:$0x1] }
  0xa2   :  { %654 = vst [vmem:[#allocation2 + $0xc] sm:$0x1] %v653_v12 }
  0xa3   :  { %679 = vsyncadd [#allocation3 + $0xc], 16  ;;  %s2398_s13 = sld [smem:[#allocation5 + $0xd]]  ;;  %s2399_s14 = sld [smem:[#allocation6 + $0x1]] }
  0xa9   :  { %s683_s15 = sadd.s32 %s2399_s14, %s2398_s13 }
  0xaa   :  { %s684_s18 = scalar_lea.vmem %s2723_s2, %s683_s15 }
  0xab   :  { %v704_v13 = vld [vmem:[%s684_s18] sm:$0x1] }
  0xac   :  { %705 = vst [vmem:[#allocation2 + $0xd] sm:$0x1] %v704_v13 }
  0xad   :  { %730 = vsyncadd [#allocation3 + $0xd], 16  ;;  %s2400_s19 = sld [smem:[#allocation5 + $0xe]]  ;;  %s2401_s20 = sld [smem:[#allocation6 + $0x2]] }
  0xb3   :  { %s734_s0 = sadd.s32 %s2401_s20, %s2400_s19 }
  0xb4   :  { %s735_s22 = scalar_lea.vmem %s2723_s2, %s734_s0 }
  0xb5   :  { %v755_v14 = vld [vmem:[%s735_s22] sm:$0x1] }
  0xb6   :  { %756 = vst [vmem:[#allocation2 + $0xe] sm:$0x1] %v755_v14 }
  0xb7   :  { %781 = vsyncadd [#allocation3 + $0xe], 16  ;;  %s2402_s23 = sld [smem:[#allocation5 + $0xf]]  ;;  %s2403_s24 = sld [smem:[#allocation6 + $0x3]] }
  0xbd   :  { %s785_s25 = sadd.s32 %s2403_s24, %s2402_s23 }
  0xbe   :  { %s786_s28 = scalar_lea.vmem %s2723_s2, %s785_s25 }
  0xbf   :  { %v806_v15 = vld [vmem:[%s786_s28] sm:$0x1] }
  0xc0   :  { %807 = vst [vmem:[#allocation2 + $0xf] sm:$0x1] %v806_v15 }
  0xc1   :  { %832 = vsyncadd [#allocation3 + $0xf], 16  ;;  %s2404_s29 = sld [smem:[#allocation5 + $0x10]] }
  0xc2   :  { %s835_s30 = sld [smem:[#allocation6]] }
  0xc8   :  { %s836_s4 = sadd.s32 %s2404_s29, %s835_s30 }
  0xc9   :  { %s837_s7 = scalar_lea.vmem %s2723_s2, %s836_s4 }
  0xca   :  { %v857_v16 = vld [vmem:[%s837_s7] sm:$0x1] }
  0xcb   :  { %858 = vst [vmem:[#allocation2 + $0x10] sm:$0x1] %v857_v16 }
  0xcc   :  { %883 = vsyncadd [#allocation3 + $0x10], 16  ;;  %s2405_s8 = sld [smem:[#allocation5 + $0x11]] }
  0xcd   :  { %s2406_s9 = sld [smem:[#allocation6 + $0x1]] }
  0xd3   :  { %s887_s10 = sadd.s32 %s2406_s9, %s2405_s8 }
  0xd4   :  { %s888_s13 = scalar_lea.vmem %s2723_s2, %s887_s10 }
  0xd5   :  { %v908_v17 = vld [vmem:[%s888_s13] sm:$0x1] }
  0xd6   :  { %909 = vst [vmem:[#allocation2 + $0x11] sm:$0x1] %v908_v17 }
  0xd7   :  { %934 = vsyncadd [#allocation3 + $0x11], 16  ;;  %s2407_s14 = sld [smem:[#allocation5 + $0x12]] }
  0xd8   :  { %s2408_s15 = sld [smem:[#allocation6 + $0x2]] }
  0xde   :  { %s938_s16 = sadd.s32 %s2408_s15, %s2407_s14 }
  0xdf   :  { %s939_s19 = scalar_lea.vmem %s2723_s2, %s938_s16 }
  0xe0   :  { %v959_v18 = vld [vmem:[%s939_s19] sm:$0x1] }
  0xe1   :  { %960 = vst [vmem:[#allocation2 + $0x12] sm:$0x1] %v959_v18 }
  0xe2   :  { %985 = vsyncadd [#allocation3 + $0x12], 16  ;;  %s2409_s20 = sld [smem:[#allocation5 + $0x13]] }
  0xe3   :  { %s2410_s0 = sld [smem:[#allocation6 + $0x3]] }
  0xe9   :  { %s989_s1 = sadd.s32 %s2410_s0, %s2409_s20 }
  0xea   :  { %s990_s23 = scalar_lea.vmem %s2723_s2, %s989_s1 }
  0xeb   :  { %v1010_v19 = vld [vmem:[%s990_s23] sm:$0x1] }
  0xec   :  { %1011 = vst [vmem:[#allocation2 + $0x13] sm:$0x1] %v1010_v19 }
  0xed   :  { %1036 = vsyncadd [#allocation3 + $0x13], 16  ;;  %s2411_s24 = sld [smem:[#allocation5 + $0x14]]  ;;  %s1039_s25 = sld [smem:[#allocation6]] }
  0xf3   :  { %s1040_s26 = sadd.s32 %s2411_s24, %s1039_s25 }
  0xf4   :  { %s1041_s29 = scalar_lea.vmem %s2723_s2, %s1040_s26 }
  0xf5   :  { %v1061_v20 = vld [vmem:[%s1041_s29] sm:$0x1] }
  0xf6   :  { %1062 = vst [vmem:[#allocation2 + $0x14] sm:$0x1] %v1061_v20 }
  0xf7   :  { %1087 = vsyncadd [#allocation3 + $0x14], 16  ;;  %s2412_s30 = sld [smem:[#allocation5 + $0x15]]  ;;  %s2413_s4 = sld [smem:[#allocation6 + $0x1]] }
  0xfd   :  { %s1091_s5 = sadd.s32 %s2413_s4, %s2412_s30 }
  0xfe   :  { %s1092_s8 = scalar_lea.vmem %s2723_s2, %s1091_s5 }
  0xff   :  { %v1112_v21 = vld [vmem:[%s1092_s8] sm:$0x1] }
 0x100   :  { %1113 = vst [vmem:[#allocation2 + $0x15] sm:$0x1] %v1112_v21 }
 0x101   :  { %1138 = vsyncadd [#allocation3 + $0x15], 16  ;;  %s2414_s9 = sld [smem:[#allocation5 + $0x16]]  ;;  %s2415_s10 = sld [smem:[#allocation6 + $0x2]] }
 0x107   :  { %s1142_s11 = sadd.s32 %s2415_s10, %s2414_s9 }
 0x108   :  { %s1143_s14 = scalar_lea.vmem %s2723_s2, %s1142_s11 }
 0x109   :  { %v1163_v22 = vld [vmem:[%s1143_s14] sm:$0x1] }
 0x10a   :  { %1164 = vst [vmem:[#allocation2 + $0x16] sm:$0x1] %v1163_v22 }
 0x10b   :  { %1189 = vsyncadd [#allocation3 + $0x16], 16  ;;  %s2416_s15 = sld [smem:[#allocation5 + $0x17]]  ;;  %s2417_s16 = sld [smem:[#allocation6 + $0x3]] }
 0x111   :  { %s1193_s17 = sadd.s32 %s2417_s16, %s2416_s15 }
 0x112   :  { %s1194_s20 = scalar_lea.vmem %s2723_s2, %s1193_s17 }
 0x113   :  { %v1214_v23 = vld [vmem:[%s1194_s20] sm:$0x1] }
 0x114   :  { %1215 = vst [vmem:[#allocation2 + $0x17] sm:$0x1] %v1214_v23 }
 0x115   :  { %1240 = vsyncadd [#allocation3 + $0x17], 16  ;;  %s2418_s0 = sld [smem:[#allocation5 + $0x18]] }
 0x116   :  { %s1243_s1 = sld [smem:[#allocation6]] }
 0x11c   :  { %s1244_s21 = sadd.s32 %s2418_s0, %s1243_s1 }
 0x11d   :  { %s1245_s24 = scalar_lea.vmem %s2723_s2, %s1244_s21 }
 0x11e   :  { %v1265_v24 = vld [vmem:[%s1245_s24] sm:$0x1] }
 0x11f   :  { %1266 = vst [vmem:[#allocation2 + $0x18] sm:$0x1] %v1265_v24 }
 0x120   :  { %1291 = vsyncadd [#allocation3 + $0x18], 16  ;;  %s2419_s25 = sld [smem:[#allocation5 + $0x19]] }
 0x121   :  { %s2420_s26 = sld [smem:[#allocation6 + $0x1]] }
 0x127   :  { %s1295_s27 = sadd.s32 %s2420_s26, %s2419_s25 }
 0x128   :  { %s1296_s30 = scalar_lea.vmem %s2723_s2, %s1295_s27 }
 0x129   :  { %v1316_v25 = vld [vmem:[%s1296_s30] sm:$0x1] }
 0x12a   :  { %1317 = vst [vmem:[#allocation2 + $0x19] sm:$0x1] %v1316_v25 }
 0x12b   :  { %1342 = vsyncadd [#allocation3 + $0x19], 16  ;;  %s2421_s4 = sld [smem:[#allocation5 + $0x1a]] }
 0x12c   :  { %s2422_s5 = sld [smem:[#allocation6 + $0x2]] }
 0x132   :  { %s1346_s6 = sadd.s32 %s2422_s5, %s2421_s4 }
 0x133   :  { %s1347_s9 = scalar_lea.vmem %s2723_s2, %s1346_s6 }
 0x134   :  { %v1367_v26 = vld [vmem:[%s1347_s9] sm:$0x1] }
 0x135   :  { %1368 = vst [vmem:[#allocation2 + $0x1a] sm:$0x1] %v1367_v26 }
 0x136   :  { %1393 = vsyncadd [#allocation3 + $0x1a], 16  ;;  %s2423_s10 = sld [smem:[#allocation5 + $0x1b]] }
 0x137   :  { %s2424_s11 = sld [smem:[#allocation6 + $0x3]] }
 0x13d   :  { %s1397_s12 = sadd.s32 %s2424_s11, %s2423_s10 }
 0x13e   :  { %s1398_s15 = scalar_lea.vmem %s2723_s2, %s1397_s12 }
 0x13f   :  { %v1418_v27 = vld [vmem:[%s1398_s15] sm:$0x1] }
 0x140   :  { %1419 = vst [vmem:[#allocation2 + $0x1b] sm:$0x1] %v1418_v27 }
 0x141   :  { %1444 = vsyncadd [#allocation3 + $0x1b], 16  ;;  %s2425_s16 = sld [smem:[#allocation5 + $0x1c]]  ;;  %s1447_s17 = sld [smem:[#allocation6]] }
 0x147   :  { %s1448_s18 = sadd.s32 %s2425_s16, %s1447_s17 }
 0x148   :  { %s1449_s0 = scalar_lea.vmem %s2723_s2, %s1448_s18 }
 0x149   :  { %v1469_v28 = vld [vmem:[%s1449_s0] sm:$0x1] }
 0x14a   :  { %1470 = vst [vmem:[#allocation2 + $0x1c] sm:$0x1] %v1469_v28 }
 0x14b   :  { %1495 = vsyncadd [#allocation3 + $0x1c], 16  ;;  %s2426_s1 = sld [smem:[#allocation5 + $0x1d]]  ;;  %s2427_s21 = sld [smem:[#allocation6 + $0x1]] }
 0x151   :  { %s1499_s22 = sadd.s32 %s2427_s21, %s2426_s1 }
 0x152   :  { %s1500_s25 = scalar_lea.vmem %s2723_s2, %s1499_s22 }
 0x153   :  { %v1520_v29 = vld [vmem:[%s1500_s25] sm:$0x1] }
 0x154   :  { %1521 = vst [vmem:[#allocation2 + $0x1d] sm:$0x1] %v1520_v29 }
 0x155   :  { %1546 = vsyncadd [#allocation3 + $0x1d], 16  ;;  %s2428_s26 = sld [smem:[#allocation5 + $0x1e]]  ;;  %s2429_s27 = sld [smem:[#allocation6 + $0x2]] }
 0x15b   :  { %s1550_s28 = sadd.s32 %s2429_s27, %s2428_s26 }
 0x15c   :  { %s1551_s4 = scalar_lea.vmem %s2723_s2, %s1550_s28 }
 0x15d   :  { %v1571_v30 = vld [vmem:[%s1551_s4] sm:$0x1] }
 0x15e   :  { %1572 = vst [vmem:[#allocation2 + $0x1e] sm:$0x1] %v1571_v30 }
 0x15f   :  { %1597 = vsyncadd [#allocation3 + $0x1e], 16  ;;  %s2430_s5 = sld [smem:[#allocation5 + $0x1f]]  ;;  %s2431_s6 = sld [smem:[#allocation6 + $0x3]] }
 0x165   :  { %s1601_s7 = sadd.s32 %s2431_s6, %s2430_s5 }
 0x166   :  { %s1602_s10 = scalar_lea.vmem %s2723_s2, %s1601_s7 }
 0x167   :  { %v1622_v31 = vld [vmem:[%s1602_s10] sm:$0x1] }
 0x168   :  { %1623 = vst [vmem:[#allocation2 + $0x1f] sm:$0x1] %v1622_v31 }
 0x169   :  { %1648 = vsyncadd [#allocation3 + $0x1f], 16 }
 0x16a   :  { %2517 = dma.done.wait [#allocation3], 16 }
 0x16b   :  { %2518 = vsyncadd [#allocation3], 4294967280 }
 0x16c   :  { %2519 = dma.done.wait [#allocation3 + $0x1], 16 }
 0x16d   :  { %2520 = vsyncadd [#allocation3 + $0x1], 4294967280 }
 0x16e   :  { %2521 = dma.done.wait [#allocation3 + $0x2], 16 }
 0x16f   :  { %2522 = vsyncadd [#allocation3 + $0x2], 4294967280 }
 0x170   :  { %2523 = dma.done.wait [#allocation3 + $0x3], 16 }
 0x171   :  { %2524 = vsyncadd [#allocation3 + $0x3], 4294967280 }
 0x172   :  { %2525 = dma.done.wait [#allocation3 + $0x4], 16 }
 0x173   :  { %2526 = vsyncadd [#allocation3 + $0x4], 4294967280 }
 0x174   :  { %2527 = dma.done.wait [#allocation3 + $0x5], 16 }
 0x175   :  { %2528 = vsyncadd [#allocation3 + $0x5], 4294967280 }
 0x176   :  { %2529 = dma.done.wait [#allocation3 + $0x6], 16 }
 0x177   :  { %2530 = vsyncadd [#allocation3 + $0x6], 4294967280 }
 0x178   :  { %2531 = dma.done.wait [#allocation3 + $0x7], 16 }
 0x179   :  { %2532 = vsyncadd [#allocation3 + $0x7], 4294967280 }
 0x17a   :  { %2533 = dma.done.wait [#allocation3 + $0x8], 16 }
 0x17b   :  { %2534 = vsyncadd [#allocation3 + $0x8], 4294967280 }
 0x17c   :  { %2535 = dma.done.wait [#allocation3 + $0x9], 16 }
 0x17d   :  { %2536 = vsyncadd [#allocation3 + $0x9], 4294967280 }
 0x17e   :  { %2537 = dma.done.wait [#allocation3 + $0xa], 16 }
 0x17f   :  { %2538 = vsyncadd [#allocation3 + $0xa], 4294967280 }
 0x180   :  { %2539 = dma.done.wait [#allocation3 + $0xb], 16 }
 0x181   :  { %2540 = vsyncadd [#allocation3 + $0xb], 4294967280 }
 0x182   :  { %2541 = dma.done.wait [#allocation3 + $0xc], 16 }
 0x183   :  { %2542 = vsyncadd [#allocation3 + $0xc], 4294967280 }
 0x184   :  { %2543 = dma.done.wait [#allocation3 + $0xd], 16 }
 0x185   :  { %2544 = vsyncadd [#allocation3 + $0xd], 4294967280 }
 0x186   :  { %2545 = dma.done.wait [#allocation3 + $0xe], 16 }
 0x187   :  { %2546 = vsyncadd [#allocation3 + $0xe], 4294967280 }
 0x188   :  { %2547 = dma.done.wait [#allocation3 + $0xf], 16 }
 0x189   :  { %2548 = vsyncadd [#allocation3 + $0xf], 4294967280 }
 0x18a   :  { %2549 = dma.done.wait [#allocation3 + $0x10], 16 }
 0x18b   :  { %2550 = vsyncadd [#allocation3 + $0x10], 4294967280 }
 0x18c   :  { %2551 = dma.done.wait [#allocation3 + $0x11], 16 }
 0x18d   :  { %2552 = vsyncadd [#allocation3 + $0x11], 4294967280 }
 0x18e   :  { %2553 = dma.done.wait [#allocation3 + $0x12], 16 }
 0x18f   :  { %2554 = vsyncadd [#allocation3 + $0x12], 4294967280 }
 0x190   :  { %2555 = dma.done.wait [#allocation3 + $0x13], 16 }
 0x191   :  { %2556 = vsyncadd [#allocation3 + $0x13], 4294967280 }
 0x192   :  { %2557 = dma.done.wait [#allocation3 + $0x14], 16 }
 0x193   :  { %2558 = vsyncadd [#allocation3 + $0x14], 4294967280 }
 0x194   :  { %2559 = dma.done.wait [#allocation3 + $0x15], 16 }
 0x195   :  { %2560 = vsyncadd [#allocation3 + $0x15], 4294967280 }
 0x196   :  { %2561 = dma.done.wait [#allocation3 + $0x16], 16 }
 0x197   :  { %2562 = vsyncadd [#allocation3 + $0x16], 4294967280 }
 0x198   :  { %2563 = dma.done.wait [#allocation3 + $0x17], 16 }
 0x199   :  { %2564 = vsyncadd [#allocation3 + $0x17], 4294967280 }
 0x19a   :  { %2565 = dma.done.wait [#allocation3 + $0x18], 16 }
 0x19b   :  { %2566 = vsyncadd [#allocation3 + $0x18], 4294967280 }
 0x19c   :  { %2567 = dma.done.wait [#allocation3 + $0x19], 16 }
 0x19d   :  { %2568 = vsyncadd [#allocation3 + $0x19], 4294967280 }
 0x19e   :  { %2569 = dma.done.wait [#allocation3 + $0x1a], 16 }
 0x19f   :  { %2570 = vsyncadd [#allocation3 + $0x1a], 4294967280 }
 0x1a0   :  { %2571 = dma.done.wait [#allocation3 + $0x1b], 16 }
 0x1a1   :  { %2572 = vsyncadd [#allocation3 + $0x1b], 4294967280 }
 0x1a2   :  { %2573 = dma.done.wait [#allocation3 + $0x1c], 16 }
 0x1a3   :  { %2574 = vsyncadd [#allocation3 + $0x1c], 4294967280 }
 0x1a4   :  { %2575 = dma.done.wait [#allocation3 + $0x1d], 16 }
 0x1a5   :  { %2576 = vsyncadd [#allocation3 + $0x1d], 4294967280 }
 0x1a6   :  { %2577 = dma.done.wait [#allocation3 + $0x1e], 16 }
 0x1a7   :  { %2578 = vsyncadd [#allocation3 + $0x1e], 4294967280 }
 0x1a8   :  { %2579 = dma.done.wait [#allocation3 + $0x1f], 16 }
 0x1a9   :  { %2580 = vsyncadd [#allocation3 + $0x1f], 4294967280  ;;  %s2585_s2 = smov [#allocation7]   ;;  %vm1718_vm0 = vcmask 130048   ;;  %v1714_v32 = vld [vmem:[#allocation2] sm:$0xff]  ;;  %v1715_v33 = vld [vmem:[#allocation2 + $0x8] sm:$0xff] }
 0x1aa   :  { %s1728_s11 = sshll.u32 %s2585_s2, 4  ;;  %v1716_v34 = vld [vmem:[#allocation2 + $0x10] sm:$0xff]  ;;  %1719 = vst.msk [vmem:[#allocation7] sm:$0xff] %vm1718_vm0, %v1714_v32  ;;  %1720 = vst.msk [vmem:[#allocation7 + $0x8] sm:$0xff] %vm1718_vm0, %v1715_v33  ;;  %v1717_v35 = vld [vmem:[#allocation2 + $0x18] sm:$0xff]  ;;  %s1729_s11 = int_to_ptr.vmem [resolvable:$true] %s1728_s11 }
 0x1ab   :  { %1721 = vst.msk [vmem:[#allocation7 + $0x10] sm:$0xff] %vm1718_vm0, %v1716_v34  ;;  %1722 = vst.msk [vmem:[#allocation7 + $0x18] sm:$0xff] %vm1718_vm0, %v1717_v35  ;;  %s2493_s12 = scalar_lea.vmem %s1729_s11, 512  ;;  %p2498_p11 = scmp.lt.s32.totalorder %s1729_s11, %s1729_s11 }
 0x1ac   :  { %p2494_p10 = scmp.ne.s32.totalorder %s1729_s11, %s2493_s12  ;;  %p2499_p12 = scmp.lt.s32.totalorder %s2493_s12, %s2493_s12 }
 0x1ae   :  { %p2500_p13 = por %p2499_p12, %p2498_p11 }
 0x1b0   :  { %p2501_p0 = pnand %p2500_p13, %p2494_p10 }
 0x1b2   :  { %2504 = shalt.err (!%p2501_p0)
}
 0x1b3   :  { %s2505_s15 = scalar_lea.hbm %s2724_s3, 512 }
 0x1b4   :  { %p2506_p1 = scmp.ne.s32.totalorder %s2724_s3, %s2505_s15  ;;  %p2509_p2 = scmp.lt.u32.totalorder %s2505_s15, %s2724_s3 }
 0x1b6   :  { %p2511_p3 = pnand %p2509_p2, %p2506_p1 }
 0x1b8   :  { %2514 = shalt.err (!%p2511_p3)
}
 0x1b9   :  { %s2586_s20 = smov 128   ;;  %s2587_s0 = smov 8  }
 0x1ba   :  { %1734 = dma.vmem_to_hbm [thread:$0]  %s1729_s11, 512, %s2724_s3, [#allocation8], %s2586_s20, %s2586_s20, %s2587_s0  }
 0x1bb   :  { %2581 = dma.done.wait [#allocation8], 512  }
 0x1bc   :  { %2582 = vsyncadd [#allocation8], 4294966784 }
 0x1bd   :  { %1738 = vsyncpa [#allocation8], 1 }
 0x1be   :  { %1739 = vsyncmov [#allocation3] }
 0x1c1   :  { %s1740_s22 = vpop.sfrf %1739 }
 0x1c2   :  { %p2432_p4 = scmp.ne.s32.totalorder %s1740_s22, 0 }
 0x1c4   :  { %1744 = shalt.err (%p2432_p4)  }
 0x1c5   :  { %1746 = vsyncmov [#allocation3 + $0x1] }
 0x1c8   :  { %s1747_s23 = vpop.sfrf %1746 }
 0x1c9   :  { %p2433_p5 = scmp.ne.s32.totalorder %s1747_s23, 0 }
 0x1cb   :  { %1751 = shalt.err (%p2433_p5)  }
 0x1cc   :  { %1753 = vsyncmov [#allocation3 + $0x2] }
 0x1cf   :  { %s1754_s24 = vpop.sfrf %1753 }
 0x1d0   :  { %p2434_p6 = scmp.ne.s32.totalorder %s1754_s24, 0 }
 0x1d2   :  { %1758 = shalt.err (%p2434_p6)  }
 0x1d3   :  { %1760 = vsyncmov [#allocation3 + $0x3] }
 0x1d6   :  { %s1761_s25 = vpop.sfrf %1760 }
 0x1d7   :  { %p2435_p7 = scmp.ne.s32.totalorder %s1761_s25, 0 }
 0x1d9   :  { %1765 = shalt.err (%p2435_p7)  }
 0x1da   :  { %1767 = vsyncmov [#allocation3 + $0x4] }
 0x1dd   :  { %s1768_s3 = vpop.sfrf %1767 }
 0x1de   :  { %p2436_p8 = scmp.ne.s32.totalorder %s1768_s3, 0 }
 0x1e0   :  { %1772 = shalt.err (%p2436_p8)  }
 0x1e1   :  { %1774 = vsyncmov [#allocation3 + $0x5] }
 0x1e4   :  { %s1775_s26 = vpop.sfrf %1774 }
 0x1e5   :  { %p2437_p9 = scmp.ne.s32.totalorder %s1775_s26, 0 }
 0x1e7   :  { %1779 = shalt.err (%p2437_p9)  }
 0x1e8   :  { %1781 = vsyncmov [#allocation3 + $0x6] }
 0x1eb   :  { %s1782_s27 = vpop.sfrf %1781 }
 0x1ec   :  { %p2438_p10 = scmp.ne.s32.totalorder %s1782_s27, 0 }
 0x1ee   :  { %1786 = shalt.err (%p2438_p10)  }
 0x1ef   :  { %1788 = vsyncmov [#allocation3 + $0x7] }
 0x1f2   :  { %s1789_s28 = vpop.sfrf %1788 }
 0x1f3   :  { %p2439_p11 = scmp.ne.s32.totalorder %s1789_s28, 0 }
 0x1f5   :  { %1793 = shalt.err (%p2439_p11)  }
 0x1f6   :  { %1795 = vsyncmov [#allocation3 + $0x8] }
 0x1f9   :  { %s1796_s29 = vpop.sfrf %1795 }
 0x1fa   :  { %p2440_p12 = scmp.ne.s32.totalorder %s1796_s29, 0 }
 0x1fc   :  { %1800 = shalt.err (%p2440_p12)  }
 0x1fd   :  { %1802 = vsyncmov [#allocation3 + $0x9] }
 0x200   :  { %s1803_s30 = vpop.sfrf %1802 }
 0x201   :  { %p2441_p13 = scmp.ne.s32.totalorder %s1803_s30, 0 }
 0x203   :  { %1807 = shalt.err (%p2441_p13)  }
 0x204   :  { %1809 = vsyncmov [#allocation3 + $0xa] }
 0x207   :  { %s1810_s4 = vpop.sfrf %1809 }
 0x208   :  { %p2442_p0 = scmp.ne.s32.totalorder %s1810_s4, 0 }
 0x20a   :  { %1814 = shalt.err (%p2442_p0)  }
 0x20b   :  { %1816 = vsyncmov [#allocation3 + $0xb] }
 0x20e   :  { %s1817_s5 = vpop.sfrf %1816 }
 0x20f   :  { %p2443_p1 = scmp.ne.s32.totalorder %s1817_s5, 0 }
 0x211   :  { %1821 = shalt.err (%p2443_p1)  }
 0x212   :  { %1823 = vsyncmov [#allocation3 + $0xc] }
 0x215   :  { %s1824_s6 = vpop.sfrf %1823 }
 0x216   :  { %p2444_p2 = scmp.ne.s32.totalorder %s1824_s6, 0 }
 0x218   :  { %1828 = shalt.err (%p2444_p2)  }
 0x219   :  { %1830 = vsyncmov [#allocation3 + $0xd] }
 0x21c   :  { %s1831_s7 = vpop.sfrf %1830 }
 0x21d   :  { %p2445_p3 = scmp.ne.s32.totalorder %s1831_s7, 0 }
 0x21f   :  { %1835 = shalt.err (%p2445_p3)  }
 0x220   :  { %1837 = vsyncmov [#allocation3 + $0xe] }
 0x223   :  { %s1838_s8 = vpop.sfrf %1837 }
 0x224   :  { %p2446_p4 = scmp.ne.s32.totalorder %s1838_s8, 0 }
 0x226   :  { %1842 = shalt.err (%p2446_p4)  }
 0x227   :  { %1844 = vsyncmov [#allocation3 + $0xf] }
 0x22a   :  { %s1845_s9 = vpop.sfrf %1844 }
 0x22b   :  { %p2447_p5 = scmp.ne.s32.totalorder %s1845_s9, 0 }
 0x22d   :  { %1849 = shalt.err (%p2447_p5)  }
 0x22e   :  { %1851 = vsyncmov [#allocation3 + $0x10] }
 0x231   :  { %s1852_s10 = vpop.sfrf %1851 }
 0x232   :  { %p2448_p6 = scmp.ne.s32.totalorder %s1852_s10, 0 }
 0x234   :  { %1856 = shalt.err (%p2448_p6)  }
 0x235   :  { %1858 = vsyncmov [#allocation3 + $0x11] }
 0x238   :  { %s1859_s2 = vpop.sfrf %1858 }
 0x239   :  { %p2449_p7 = scmp.ne.s32.totalorder %s1859_s2, 0 }
 0x23b   :  { %1863 = shalt.err (%p2449_p7)  }
 0x23c   :  { %1865 = vsyncmov [#allocation3 + $0x12] }
 0x23f   :  { %s1866_s11 = vpop.sfrf %1865 }
 0x240   :  { %p2450_p8 = scmp.ne.s32.totalorder %s1866_s11, 0 }
 0x242   :  { %1870 = shalt.err (%p2450_p8)  }
 0x243   :  { %1872 = vsyncmov [#allocation3 + $0x13] }
 0x246   :  { %s1873_s12 = vpop.sfrf %1872 }
 0x247   :  { %p2451_p9 = scmp.ne.s32.totalorder %s1873_s12, 0 }
 0x249   :  { %1877 = shalt.err (%p2451_p9)  }
 0x24a   :  { %1879 = vsyncmov [#allocation3 + $0x14] }
 0x24d   :  { %s1880_s13 = vpop.sfrf %1879 }
 0x24e   :  { %p2452_p10 = scmp.ne.s32.totalorder %s1880_s13, 0 }
 0x250   :  { %1884 = shalt.err (%p2452_p10)  }
 0x251   :  { %1886 = vsyncmov [#allocation3 + $0x15] }
 0x254   :  { %s1887_s14 = vpop.sfrf %1886 }
 0x255   :  { %p2453_p11 = scmp.ne.s32.totalorder %s1887_s14, 0 }
 0x257   :  { %1891 = shalt.err (%p2453_p11)  }
 0x258   :  { %1893 = vsyncmov [#allocation3 + $0x16] }
 0x25b   :  { %s1894_s15 = vpop.sfrf %1893 }
 0x25c   :  { %p2454_p12 = scmp.ne.s32.totalorder %s1894_s15, 0 }
 0x25e   :  { %1898 = shalt.err (%p2454_p12)  }
 0x25f   :  { %1900 = vsyncmov [#allocation3 + $0x17] }
 0x262   :  { %s1901_s16 = vpop.sfrf %1900 }
 0x263   :  { %p2455_p13 = scmp.ne.s32.totalorder %s1901_s16, 0 }
 0x265   :  { %1905 = shalt.err (%p2455_p13)  }
 0x266   :  { %1907 = vsyncmov [#allocation3 + $0x18] }
 0x269   :  { %s1908_s17 = vpop.sfrf %1907 }
 0x26a   :  { %p2456_p0 = scmp.ne.s32.totalorder %s1908_s17, 0 }
 0x26c   :  { %1912 = shalt.err (%p2456_p0)  }
 0x26d   :  { %1914 = vsyncmov [#allocation3 + $0x19] }
 0x270   :  { %s1915_s18 = vpop.sfrf %1914 }
 0x271   :  { %p2457_p1 = scmp.ne.s32.totalorder %s1915_s18, 0 }
 0x273   :  { %1919 = shalt.err (%p2457_p1)  }
 0x274   :  { %1921 = vsyncmov [#allocation3 + $0x1a] }
 0x277   :  { %s1922_s19 = vpop.sfrf %1921 }
 0x278   :  { %p2458_p2 = scmp.ne.s32.totalorder %s1922_s19, 0 }
 0x27a   :  { %1926 = shalt.err (%p2458_p2)  }
 0x27b   :  { %1928 = vsyncmov [#allocation3 + $0x1b] }
 0x27e   :  { %s1929_s20 = vpop.sfrf %1928 }
 0x27f   :  { %p2459_p3 = scmp.ne.s32.totalorder %s1929_s20, 0 }
 0x281   :  { %1933 = shalt.err (%p2459_p3)  }
 0x282   :  { %1935 = vsyncmov [#allocation3 + $0x1c] }
 0x285   :  { %s1936_s0 = vpop.sfrf %1935 }
 0x286   :  { %p2460_p4 = scmp.ne.s32.totalorder %s1936_s0, 0 }
 0x288   :  { %1940 = shalt.err (%p2460_p4)  }
 0x289   :  { %1942 = vsyncmov [#allocation3 + $0x1d] }
 0x28c   :  { %s1943_s1 = vpop.sfrf %1942 }
 0x28d   :  { %p2461_p5 = scmp.ne.s32.totalorder %s1943_s1, 0 }
 0x28f   :  { %1947 = shalt.err (%p2461_p5)  }
 0x290   :  { %1949 = vsyncmov [#allocation3 + $0x1e] }
 0x293   :  { %s1950_s21 = vpop.sfrf %1949 }
 0x294   :  { %p2462_p6 = scmp.ne.s32.totalorder %s1950_s21, 0 }
 0x296   :  { %1954 = shalt.err (%p2462_p6)  }
 0x297   :  { %1956 = vsyncmov [#allocation3 + $0x1f] }
 0x29a   :  { %s1957_s22 = vpop.sfrf %1956 }
 0x29b   :  { %p2463_p7 = scmp.ne.s32.totalorder %s1957_s22, 0 }
 0x29d   :  { %1961 = shalt.err (%p2463_p7)  }

</bundles_post_ra>
